<compile_context>
chip_gen: v7x
topology: tpu7x:2x2x1
jax: 0.10.0
libtpu: 0.0.40
codegen_flags: <defaults>
</compile_context>

<pallas_src>
import numpy as np
import jax
import jax.numpy as jnp
from jax.experimental import pallas as pl
from jax.experimental.pallas import tpu as pltpu

LANE = 128
SB_MAX_DEFAULT = 256      # max sublanes per grid step (256 * 128 = 32768 samples)
STRIP = 8                 # sublanes per in-kernel strip (one f32 vreg per tile)

# ---- SMEM parameter layout --------------------------------------------------
_D0 = 0                                   # d[0]  (joint 0 has r = 0, alpha = 0)
_J_BASE = 1                               # joints 1..4: ca, sa, r, d*sa, d*ca
_A_BASE = _J_BASE + 4 * 5                 # 21: joint-5 (R5 @ W) cos coefficients (9)
_B_BASE = _A_BASE + 9                     # 30: joint-5 sin coefficients (9)
_C_BASE = _B_BASE + 9                     # 39: joint-5 constants, rows 1..2 (6)
_T5_BASE = _C_BASE + 6                    # 45: joint-5 translation (3)
_OFF_BASE = _T5_BASE + 3                  # 48: theta offsets (6)
_N_PARAMS = _OFF_BASE + 6                 # 54


# ---- trace-time structural-constant folding ---------------------------------
def _mul(a, b):
    if isinstance(a, float):
        if a == 0.0:
            return 0.0
        if a == 1.0:
            return b
    if isinstance(b, float):
        if b == 0.0:
            return 0.0
        if b == 1.0:
            return a
    return a * b


def _add(a, b):
    if isinstance(a, float) and a == 0.0:
        return b
    if isinstance(b, float) and b == 0.0:
        return a
    return a + b


def _acc(terms):
    out = 0.0
    for t in terms:
        out = _add(out, t)
    return out


def _compose(R1, t1, R2, t2):
    """Affine compose: (R1,t1) then (R2,t2) -> (R1@R2, R1@t2 + t1)."""
    R = [[_acc([_mul(R1[a][k], R2[k][b]) for k in range(3)]) for b in range(3)]
         for a in range(3)]
    t = [_add(_acc([_mul(R1[a][k], t2[k]) for k in range(3)]), t1[a])
         for a in range(3)]
    return R, t


# ---- kernel ------------------------------------------------------------------
def _fk_kernel(params_ref, theta_ref, out_ref):
    sb = theta_ref.shape[1]
    n_strips = sb // STRIP
    strip_shape = (STRIP, LANE)

    def do_strip(row0):
        # per-joint angle load, in-kernel offset subtraction, sin/cos
        ct, st = [], []
        for i in range(6):
            a = theta_ref[i, pl.ds(row0, STRIP), :] - params_ref[_OFF_BASE + i]
            ct.append(jnp.cos(a))
            st.append(jnp.sin(a))

        # joint 0: r = 0, alpha = 0 (hard-coded in the PyTorch forward)
        R = [[ct[0], -st[0], 0.0],
             [st[0],  ct[0], 0.0],
             [0.0,    0.0,   1.0]]
        t = [0.0, 0.0, params_ref[_D0]]

        # joints 1..4
        for i in range(1, 5):
            base = _J_BASE + 5 * (i - 1)
            ca = params_ref[base + 0]
            sa = params_ref[base + 1]
            rr = params_ref[base + 2]
            dsa = params_ref[base + 3]            # d_i * sin(alpha_{i-1})
            dca = params_ref[base + 4]            # d_i * cos(alpha_{i-1})
            Ri = [[ct[i],      -st[i],      0.0],
                  [st[i] * ca,  ct[i] * ca, -sa],
                  [st[i] * sa,  ct[i] * sa,  ca]]
            R, t = _compose(R, t, Ri, [rr, -dsa, dca])

        # joint 5 with the fixed we->ee rotation folded in:
        #   (R5 @ W)[a][b] = A[a][b]*cos(th5) + B[a][b]*sin(th5) + C[a][b]
        # (C row 0 is structurally zero and is not stored.)
        R5W = []
        for a in range(3):
            row = []
            for b in range(3):
                v = (params_ref[_A_BASE + 3 * a + b] * ct[5]
                     + params_ref[_B_BASE + 3 * a + b] * st[5])
                if a > 0:
                    v = v + params_ref[_C_BASE + 3 * (a - 1) + b]
                row.append(v)
            R5W.append(row)
        t5 = [params_ref[_T5_BASE + k] for k in range(3)]
        Rf, tf = _compose(R, t, R5W, t5)

        def store(idx, v):
            if not (hasattr(v, "shape") and v.shape == strip_shape):
                # only taken if an entry folds to a scalar (never with real params)
                v = jnp.broadcast_to(jnp.asarray(v, jnp.float32), strip_shape)
            out_ref[idx, pl.ds(row0, STRIP), :] = v

        for a in range(3):
            for b in range(3):
                store(3 * a + b, Rf[a][b])        # rows 0..8 : rotation, row-major
        for a in range(3):
            store(9 + a, tf[a])                   # rows 9..11: translation

    if n_strips <= 8:
        for j in range(n_strips):                 # small static unroll
            do_strip(j * STRIP)
    else:
        @pl.loop(0, n_strips)
        def _(j):
            do_strip(pl.multiple_of(j * STRIP, STRIP))


# ---- wrapper -----------------------------------------------------------------
def mat_we_ee(v):
    """Rodrigues rotation from a rotation vector, matching torch_Mat_we_ee."""
    th = jnp.sqrt(jnp.sum(v ** 2))
    # TODO(synk): like the PyTorch module, no guard for ||rotvec|| == 0.
    vb = v / th
    cth = jnp.cos(th)
    sth = jnp.sin(th)

    def p_dash(p):
        p = jnp.asarray(p, jnp.float32)
        cross = jnp.array([vb[1] * p[2] - vb[2] * p[1],
                           vb[2] * p[0] - vb[0] * p[2],
                           vb[0] * p[1] - vb[1] * p[0]])
        return p * cth + vb * jnp.sum(p * vb) * (1.0 - cth) + cross * sth

    u1 = p_dash([1.0, 0.0, 0.0])
    u2 = p_dash([0.0, 1.0, 0.0])
    u3 = p_dash([0.0, 0.0, 1.0])
    R = jnp.stack([u1, u2, u3], axis=1)           # vstack(...).T
    top = jnp.concatenate([R, jnp.zeros((3, 1), jnp.float32)], axis=1)
    bot = jnp.array([[0.0, 0.0, 0.0, 1.0]], jnp.float32)
    return jnp.concatenate([top, bot], axis=0)


def fk_forward(theta, d, r, alpha, theta_offset, rotparam_we_ee,
               sb_max=SB_MAX_DEFAULT, packed_output=False):
    theta = jnp.asarray(theta, jnp.float32)
    d = jnp.asarray(d, jnp.float32)
    r = jnp.asarray(r, jnp.float32)
    alpha = jnp.asarray(alpha, jnp.float32)
    off = jnp.asarray(theta_offset, jnp.float32)
    B = theta.shape[0]

    # ---- tiling: pack batch into (n_sub_pad, 128); padding bounded per step ----
    n_sub = -(-B // LANE)                                  # ceil(B / 128)
    n_sub8 = ((n_sub + 7) // 8) * 8                        # sublane multiple
    steps = max(1, -(-n_sub8 // max(8, int(sb_max))))
    if n_sub8 >= 16:
        steps = max(steps, 2)                              # keep both v7x TCs busy
    sb = ((-(-n_sub8 // steps) + 7) // 8) * 8              # block sublanes
    n_sub_pad = steps * sb
    B_pad = n_sub_pad * LANE

    # input pack: (B,6) -> (6, n_sub_pad, 128); offsets subtracted in-kernel
    theta_t = (jnp.zeros((6, B_pad), jnp.float32)
               .at[:, :B].set(theta.T)
               .reshape(6, n_sub_pad, LANE))

    # ---- scalar parameter preprocessing (once, plain JAX) ----
    ca = jnp.cos(alpha)
    sa = jnp.sin(alpha)
    scal = [d[0]]
    for i in range(1, 5):
        scal += [ca[i - 1], sa[i - 1], r[i - 1],
                 d[i] * sa[i - 1], d[i] * ca[i - 1]]
    W = mat_we_ee(jnp.asarray(rotparam_we_ee, jnp.float32))[:3, :3]
    A = jnp.stack([W[0],           ca[4] * W[1], sa[4] * W[1]])   # * cos(th5)
    Bc = jnp.stack([-W[1],         ca[4] * W[0], sa[4] * W[0]])   # * sin(th5)
    C = jnp.stack([-sa[4] * W[2],  ca[4] * W[2]])                 # rows 1..2 const
    t5 = jnp.stack([r[4], -d[5] * sa[4], d[5] * ca[4]])
    params = jnp.concatenate([jnp.stack(scal), A.reshape(-1), Bc.reshape(-1),
                              C.reshape(-1), t5, off]).astype(jnp.float32)
    assert params.shape == (_N_PARAMS,)

    out = pl.pallas_call(
        _fk_kernel,
        out_shape=jax.ShapeDtypeStruct((12, n_sub_pad, LANE), jnp.float32),
        grid=(steps,),
        in_specs=[pl.BlockSpec(memory_space=pltpu.MemorySpace.SMEM),
                  pl.BlockSpec((6, sb, LANE), lambda i: (0, i, 0))],
        out_specs=pl.BlockSpec((12, sb, LANE), lambda i: (0, i, 0)),
        compiler_params=pltpu.CompilerParams(
            dimension_semantics=("parallel",)),
    )(params, theta_t)

    if packed_output:
        # lane-dense layout for fused consumers: rows 0..8 rotation, 9..11 translation
        return out

    flat = out.reshape(12, B_pad)[:, :B]                   # cheap reshape + slice
    pred_R = flat[:9].T.reshape(B, 3, 3)
    pred_p = flat[9:12].T
    return pred_p, pred_R


# ----------------------- pure-JAX reference (for check) -----------------------
def _dh_ref(d, r, alpha, th):
    ct, st = jnp.cos(th), jnp.sin(th)
    ca, sa = jnp.cos(alpha), jnp.sin(alpha)
    ones, zeros = jnp.ones_like(th), jnp.zeros_like(th)
    row1 = jnp.stack([ct, -st, zeros, r * ones], axis=1)
    row2 = jnp.stack([st * ca, ct * ca, -sa * ones, -d * sa * ones], axis=1)
    row3 = jnp.stack([st * sa, ct * sa, ca * ones, d * ca * ones], axis=1)
    row4 = jnp.stack([zeros, zeros, zeros, ones], axis=1)
    return jnp.stack([row1, row2, row3, row4], axis=1)


def fk_forward_ref(theta, d, r, alpha, off, rotvec):
    M = _dh_ref(d[0], jnp.float32(0.0), jnp.float32(0.0), theta[:, 0] - off[0])
    for i in range(1, 6):
        M = M @ _dh_ref(d[i], r[i - 1], alpha[i - 1], theta[:, i] - off[i])
    M = M @ mat_we_ee(rotvec)
    return M[:, :3, 3], M[:, :3, :3]


if __name__ == "__main__":
    key = jax.random.PRNGKey(0)
    k1, k2, k3 = jax.random.split(key, 3)

    # Deterministic synthetic parameters: 27 values matching the module's
    # init_param layout (d[0:6], r[6:12], alpha[12:18], theta_offset[18:24],
    # rotparam_we_ee[24:27], with pi added to index 26 like the default init).
    init_param = 0.1 * jax.random.normal(k1, (27,), jnp.float32)
    init_param = init_param.at[26].add(jnp.float32(np.pi))
    d = init_param[0:6]
    r = init_param[6:12]
    alpha = init_param[12:18]
    theta_offset = init_param[18:24]
    rotvec = init_param[24:27]

    # small batch (8, 6) joint angles
    theta = jax.random.normal(k2, (8, 6), jnp.float32)
    pred_p, pred_R = fk_forward(theta, d, r, alpha, theta_offset, rotvec)
    jax.block_until_ready((pred_p, pred_R))

    ref_p, ref_R = fk_forward_ref(theta, d, r, alpha, theta_offset, rotvec)
    np.testing.assert_allclose(np.asarray(pred_p), np.asarray(ref_p),
                               rtol=1e-4, atol=1e-4)
    np.testing.assert_allclose(np.asarray(pred_R), np.asarray(ref_R),
                               rtol=1e-4, atol=1e-4)
    assert pred_p.shape == (8, 3) and pred_p.dtype == jnp.float32
    assert pred_R.shape == (8, 3, 3) and pred_R.dtype == jnp.float32

    # second check exercising multiple strips / grid steps and ragged padding
    theta2 = jax.random.normal(k3, (2100, 6), jnp.float32)
    p2, R2 = fk_forward(theta2, d, r, alpha, theta_offset, rotvec)
    jax.block_until_ready((p2, R2))
    rp2, rR2 = fk_forward_ref(theta2, d, r, alpha, theta_offset, rotvec)
    np.testing.assert_allclose(np.asarray(p2), np.asarray(rp2), rtol=1e-4, atol=1e-4)
    np.testing.assert_allclose(np.asarray(R2), np.asarray(rR2), rtol=1e-4, atol=1e-4)

    print("KERNEL_OK")
</pallas_src>

<mosaic_0001>
module attributes {stable_mosaic.version = 11 : i64} {
  func.func @_fk_kernel(%arg0: i32, %arg1: memref<54xf32, #tpu.memory_space<smem>>, %arg2: memref<6x8x128xf32, #tpu.memory_space<vmem>>, %arg3: memref<12x8x128xf32, #tpu.memory_space<vmem>>) attributes {dimension_semantics = [#tpu.dimension_semantics<parallel>], iteration_bounds = array<i64: 1>, scalar_prefetch = 0 : i64, scratch_operands = 0 : i64, tpu.core_type = #tpu.core_type<tc>, window_params = [{transform_indices = @transform_0, window_bounds = array<i64: 54>}, {transform_indices = @transform_1, window_bounds = array<i64: 6, 8, 128>}, {transform_indices = @transform_2, window_bounds = array<i64: 12, 8, 128>}]} {
    %c0 = arith.constant 0 : index
    %c0_0 = arith.constant 0 : index
    %c0_1 = arith.constant 0 : index
    %0 = vector.load %arg2[%c0, %c0_0, %c0_1] : memref<6x8x128xf32, #tpu.memory_space<vmem>>, vector<1x8x128xf32>
    %1 = vector.shape_cast %0 : vector<1x8x128xf32> to vector<8x128xf32>
    %c48 = arith.constant 48 : index
    %2 = memref.load %arg1[%c48] : memref<54xf32, #tpu.memory_space<smem>>
    %3 = vector.broadcast %2 : f32 to vector<8x128xf32>
    %4 = arith.subf %1, %3 : vector<8x128xf32>
    %5 = math.cos %4 : vector<8x128xf32>
    %6 = math.sin %4 : vector<8x128xf32>
    %c1 = arith.constant 1 : index
    %c0_2 = arith.constant 0 : index
    %c0_3 = arith.constant 0 : index
    %7 = vector.load %arg2[%c1, %c0_2, %c0_3] : memref<6x8x128xf32, #tpu.memory_space<vmem>>, vector<1x8x128xf32>
    %8 = vector.shape_cast %7 : vector<1x8x128xf32> to vector<8x128xf32>
    %c49 = arith.constant 49 : index
    %9 = memref.load %arg1[%c49] : memref<54xf32, #tpu.memory_space<smem>>
    %10 = vector.broadcast %9 : f32 to vector<8x128xf32>
    %11 = arith.subf %8, %10 : vector<8x128xf32>
    %12 = math.cos %11 : vector<8x128xf32>
    %13 = math.sin %11 : vector<8x128xf32>
    %c2 = arith.constant 2 : index
    %c0_4 = arith.constant 0 : index
    %c0_5 = arith.constant 0 : index
    %14 = vector.load %arg2[%c2, %c0_4, %c0_5] : memref<6x8x128xf32, #tpu.memory_space<vmem>>, vector<1x8x128xf32>
    %15 = vector.shape_cast %14 : vector<1x8x128xf32> to vector<8x128xf32>
    %c50 = arith.constant 50 : index
    %16 = memref.load %arg1[%c50] : memref<54xf32, #tpu.memory_space<smem>>
    %17 = vector.broadcast %16 : f32 to vector<8x128xf32>
    %18 = arith.subf %15, %17 : vector<8x128xf32>
    %19 = math.cos %18 : vector<8x128xf32>
    %20 = math.sin %18 : vector<8x128xf32>
    %c3 = arith.constant 3 : index
    %c0_6 = arith.constant 0 : index
    %c0_7 = arith.constant 0 : index
    %21 = vector.load %arg2[%c3, %c0_6, %c0_7] : memref<6x8x128xf32, #tpu.memory_space<vmem>>, vector<1x8x128xf32>
    %22 = vector.shape_cast %21 : vector<1x8x128xf32> to vector<8x128xf32>
    %c51 = arith.constant 51 : index
    %23 = memref.load %arg1[%c51] : memref<54xf32, #tpu.memory_space<smem>>
    %24 = vector.broadcast %23 : f32 to vector<8x128xf32>
    %25 = arith.subf %22, %24 : vector<8x128xf32>
    %26 = math.cos %25 : vector<8x128xf32>
    %27 = math.sin %25 : vector<8x128xf32>
    %c4 = arith.constant 4 : index
    %c0_8 = arith.constant 0 : index
    %c0_9 = arith.constant 0 : index
    %28 = vector.load %arg2[%c4, %c0_8, %c0_9] : memref<6x8x128xf32, #tpu.memory_space<vmem>>, vector<1x8x128xf32>
    %29 = vector.shape_cast %28 : vector<1x8x128xf32> to vector<8x128xf32>
    %c52 = arith.constant 52 : index
    %30 = memref.load %arg1[%c52] : memref<54xf32, #tpu.memory_space<smem>>
    %31 = vector.broadcast %30 : f32 to vector<8x128xf32>
    %32 = arith.subf %29, %31 : vector<8x128xf32>
    %33 = math.cos %32 : vector<8x128xf32>
    %34 = math.sin %32 : vector<8x128xf32>
    %c5 = arith.constant 5 : index
    %c0_10 = arith.constant 0 : index
    %c0_11 = arith.constant 0 : index
    %35 = vector.load %arg2[%c5, %c0_10, %c0_11] : memref<6x8x128xf32, #tpu.memory_space<vmem>>, vector<1x8x128xf32>
    %36 = vector.shape_cast %35 : vector<1x8x128xf32> to vector<8x128xf32>
    %c53 = arith.constant 53 : index
    %37 = memref.load %arg1[%c53] : memref<54xf32, #tpu.memory_space<smem>>
    %38 = vector.broadcast %37 : f32 to vector<8x128xf32>
    %39 = arith.subf %36, %38 : vector<8x128xf32>
    %40 = math.cos %39 : vector<8x128xf32>
    %41 = math.sin %39 : vector<8x128xf32>
    %cst = arith.constant 0.000000e+00 : f32
    %42 = vector.broadcast %cst : f32 to vector<8x128xf32>
    %43 = arith.subf %42, %6 : vector<8x128xf32>
    %c0_12 = arith.constant 0 : index
    %44 = memref.load %arg1[%c0_12] : memref<54xf32, #tpu.memory_space<smem>>
    %c1_13 = arith.constant 1 : index
    %45 = memref.load %arg1[%c1_13] : memref<54xf32, #tpu.memory_space<smem>>
    %c2_14 = arith.constant 2 : index
    %46 = memref.load %arg1[%c2_14] : memref<54xf32, #tpu.memory_space<smem>>
    %c3_15 = arith.constant 3 : index
    %47 = memref.load %arg1[%c3_15] : memref<54xf32, #tpu.memory_space<smem>>
    %c4_16 = arith.constant 4 : index
    %48 = memref.load %arg1[%c4_16] : memref<54xf32, #tpu.memory_space<smem>>
    %c5_17 = arith.constant 5 : index
    %49 = memref.load %arg1[%c5_17] : memref<54xf32, #tpu.memory_space<smem>>
    %cst_18 = arith.constant 0.000000e+00 : f32
    %50 = vector.broadcast %cst_18 : f32 to vector<8x128xf32>
    %51 = arith.subf %50, %13 : vector<8x128xf32>
    %52 = vector.broadcast %45 : f32 to vector<8x128xf32>
    %53 = arith.mulf %13, %52 : vector<8x128xf32>
    %54 = vector.broadcast %45 : f32 to vector<8x128xf32>
    %55 = arith.mulf %12, %54 : vector<8x128xf32>
    %cst_19 = arith.constant 0.000000e+00 : f32
    %56 = arith.subf %cst_19, %46 : f32
    %57 = vector.broadcast %46 : f32 to vector<8x128xf32>
    %58 = arith.mulf %13, %57 : vector<8x128xf32>
    %59 = vector.broadcast %46 : f32 to vector<8x128xf32>
    %60 = arith.mulf %12, %59 : vector<8x128xf32>
    %cst_20 = arith.constant 0.000000e+00 : f32
    %61 = arith.subf %cst_20, %48 : f32
    %62 = arith.mulf %5, %12 : vector<8x128xf32>
    %63 = arith.mulf %43, %53 : vector<8x128xf32>
    %64 = arith.addf %62, %63 : vector<8x128xf32>
    %65 = arith.mulf %5, %51 : vector<8x128xf32>
    %66 = arith.mulf %43, %55 : vector<8x128xf32>
    %67 = arith.addf %65, %66 : vector<8x128xf32>
    %68 = vector.broadcast %56 : f32 to vector<8x128xf32>
    %69 = arith.mulf %43, %68 : vector<8x128xf32>
    %70 = arith.mulf %6, %12 : vector<8x128xf32>
    %71 = arith.mulf %5, %53 : vector<8x128xf32>
    %72 = arith.addf %70, %71 : vector<8x128xf32>
    %73 = arith.mulf %6, %51 : vector<8x128xf32>
    %74 = arith.mulf %5, %55 : vector<8x128xf32>
    %75 = arith.addf %73, %74 : vector<8x128xf32>
    %76 = vector.broadcast %56 : f32 to vector<8x128xf32>
    %77 = arith.mulf %5, %76 : vector<8x128xf32>
    %78 = vector.broadcast %47 : f32 to vector<8x128xf32>
    %79 = arith.mulf %5, %78 : vector<8x128xf32>
    %80 = vector.broadcast %61 : f32 to vector<8x128xf32>
    %81 = arith.mulf %43, %80 : vector<8x128xf32>
    %82 = arith.addf %79, %81 : vector<8x128xf32>
    %83 = vector.broadcast %47 : f32 to vector<8x128xf32>
    %84 = arith.mulf %6, %83 : vector<8x128xf32>
    %85 = vector.broadcast %61 : f32 to vector<8x128xf32>
    %86 = arith.mulf %5, %85 : vector<8x128xf32>
    %87 = arith.addf %84, %86 : vector<8x128xf32>
    %88 = arith.addf %49, %44 : f32
    %c6 = arith.constant 6 : index
    %89 = memref.load %arg1[%c6] : memref<54xf32, #tpu.memory_space<smem>>
    %c7 = arith.constant 7 : index
    %90 = memref.load %arg1[%c7] : memref<54xf32, #tpu.memory_space<smem>>
    %c8 = arith.constant 8 : index
    %91 = memref.load %arg1[%c8] : memref<54xf32, #tpu.memory_space<smem>>
    %c9 = arith.constant 9 : index
    %92 = memref.load %arg1[%c9] : memref<54xf32, #tpu.memory_space<smem>>
    %c10 = arith.constant 10 : index
    %93 = memref.load %arg1[%c10] : memref<54xf32, #tpu.memory_space<smem>>
    %cst_21 = arith.constant 0.000000e+00 : f32
    %94 = vector.broadcast %cst_21 : f32 to vector<8x128xf32>
    %95 = arith.subf %94, %20 : vector<8x128xf32>
    %96 = vector.broadcast %89 : f32 to vector<8x128xf32>
    %97 = arith.mulf %20, %96 : vector<8x128xf32>
    %98 = vector.broadcast %89 : f32 to vector<8x128xf32>
    %99 = arith.mulf %19, %98 : vector<8x128xf32>
    %cst_22 = arith.constant 0.000000e+00 : f32
    %100 = arith.subf %cst_22, %90 : f32
    %101 = vector.broadcast %90 : f32 to vector<8x128xf32>
    %102 = arith.mulf %20, %101 : vector<8x128xf32>
    %103 = vector.broadcast %90 : f32 to vector<8x128xf32>
    %104 = arith.mulf %19, %103 : vector<8x128xf32>
    %cst_23 = arith.constant 0.000000e+00 : f32
    %105 = arith.subf %cst_23, %92 : f32
    %106 = arith.mulf %64, %19 : vector<8x128xf32>
    %107 = arith.mulf %67, %97 : vector<8x128xf32>
    %108 = arith.mulf %69, %102 : vector<8x128xf32>
    %109 = arith.addf %106, %107 : vector<8x128xf32>
    %110 = arith.addf %109, %108 : vector<8x128xf32>
    %111 = arith.mulf %64, %95 : vector<8x128xf32>
    %112 = arith.mulf %67, %99 : vector<8x128xf32>
    %113 = arith.mulf %69, %104 : vector<8x128xf32>
    %114 = arith.addf %111, %112 : vector<8x128xf32>
    %115 = arith.addf %114, %113 : vector<8x128xf32>
    %116 = vector.broadcast %100 : f32 to vector<8x128xf32>
    %117 = arith.mulf %67, %116 : vector<8x128xf32>
    %118 = vector.broadcast %89 : f32 to vector<8x128xf32>
    %119 = arith.mulf %69, %118 : vector<8x128xf32>
    %120 = arith.addf %117, %119 : vector<8x128xf32>
    %121 = arith.mulf %72, %19 : vector<8x128xf32>
    %122 = arith.mulf %75, %97 : vector<8x128xf32>
    %123 = arith.mulf %77, %102 : vector<8x128xf32>
    %124 = arith.addf %121, %122 : vector<8x128xf32>
    %125 = arith.addf %124, %123 : vector<8x128xf32>
    %126 = arith.mulf %72, %95 : vector<8x128xf32>
    %127 = arith.mulf %75, %99 : vector<8x128xf32>
    %128 = arith.mulf %77, %104 : vector<8x128xf32>
    %129 = arith.addf %126, %127 : vector<8x128xf32>
    %130 = arith.addf %129, %128 : vector<8x128xf32>
    %131 = vector.broadcast %100 : f32 to vector<8x128xf32>
    %132 = arith.mulf %75, %131 : vector<8x128xf32>
    %133 = vector.broadcast %89 : f32 to vector<8x128xf32>
    %134 = arith.mulf %77, %133 : vector<8x128xf32>
    %135 = arith.addf %132, %134 : vector<8x128xf32>
    %136 = arith.mulf %58, %19 : vector<8x128xf32>
    %137 = arith.mulf %60, %97 : vector<8x128xf32>
    %138 = vector.broadcast %45 : f32 to vector<8x128xf32>
    %139 = arith.mulf %138, %102 : vector<8x128xf32>
    %140 = arith.addf %136, %137 : vector<8x128xf32>
    %141 = arith.addf %140, %139 : vector<8x128xf32>
    %142 = arith.mulf %58, %95 : vector<8x128xf32>
    %143 = arith.mulf %60, %99 : vector<8x128xf32>
    %144 = vector.broadcast %45 : f32 to vector<8x128xf32>
    %145 = arith.mulf %144, %104 : vector<8x128xf32>
    %146 = arith.addf %142, %143 : vector<8x128xf32>
    %147 = arith.addf %146, %145 : vector<8x128xf32>
    %148 = vector.broadcast %100 : f32 to vector<8x128xf32>
    %149 = arith.mulf %60, %148 : vector<8x128xf32>
    %150 = arith.mulf %45, %89 : f32
    %151 = vector.broadcast %150 : f32 to vector<8x128xf32>
    %152 = arith.addf %149, %151 : vector<8x128xf32>
    %153 = vector.broadcast %91 : f32 to vector<8x128xf32>
    %154 = arith.mulf %64, %153 : vector<8x128xf32>
    %155 = vector.broadcast %105 : f32 to vector<8x128xf32>
    %156 = arith.mulf %67, %155 : vector<8x128xf32>
    %157 = vector.broadcast %93 : f32 to vector<8x128xf32>
    %158 = arith.mulf %69, %157 : vector<8x128xf32>
    %159 = arith.addf %154, %156 : vector<8x128xf32>
    %160 = arith.addf %159, %158 : vector<8x128xf32>
    %161 = arith.addf %160, %82 : vector<8x128xf32>
    %162 = vector.broadcast %91 : f32 to vector<8x128xf32>
    %163 = arith.mulf %72, %162 : vector<8x128xf32>
    %164 = vector.broadcast %105 : f32 to vector<8x128xf32>
    %165 = arith.mulf %75, %164 : vector<8x128xf32>
    %166 = vector.broadcast %93 : f32 to vector<8x128xf32>
    %167 = arith.mulf %77, %166 : vector<8x128xf32>
    %168 = arith.addf %163, %165 : vector<8x128xf32>
    %169 = arith.addf %168, %167 : vector<8x128xf32>
    %170 = arith.addf %169, %87 : vector<8x128xf32>
    %171 = vector.broadcast %91 : f32 to vector<8x128xf32>
    %172 = arith.mulf %58, %171 : vector<8x128xf32>
    %173 = vector.broadcast %105 : f32 to vector<8x128xf32>
    %174 = arith.mulf %60, %173 : vector<8x128xf32>
    %175 = arith.mulf %45, %93 : f32
    %176 = arith.addf %172, %174 : vector<8x128xf32>
    %177 = vector.broadcast %175 : f32 to vector<8x128xf32>
    %178 = arith.addf %176, %177 : vector<8x128xf32>
    %179 = vector.broadcast %88 : f32 to vector<8x128xf32>
    %180 = arith.addf %178, %179 : vector<8x128xf32>
    %c11 = arith.constant 11 : index
    %181 = memref.load %arg1[%c11] : memref<54xf32, #tpu.memory_space<smem>>
    %c12 = arith.constant 12 : index
    %182 = memref.load %arg1[%c12] : memref<54xf32, #tpu.memory_space<smem>>
    %c13 = arith.constant 13 : index
    %183 = memref.load %arg1[%c13] : memref<54xf32, #tpu.memory_space<smem>>
    %c14 = arith.constant 14 : index
    %184 = memref.load %arg1[%c14] : memref<54xf32, #tpu.memory_space<smem>>
    %c15 = arith.constant 15 : index
    %185 = memref.load %arg1[%c15] : memref<54xf32, #tpu.memory_space<smem>>
    %cst_24 = arith.constant 0.000000e+00 : f32
    %186 = vector.broadcast %cst_24 : f32 to vector<8x128xf32>
    %187 = arith.subf %186, %27 : vector<8x128xf32>
    %188 = vector.broadcast %181 : f32 to vector<8x128xf32>
    %189 = arith.mulf %27, %188 : vector<8x128xf32>
    %190 = vector.broadcast %181 : f32 to vector<8x128xf32>
    %191 = arith.mulf %26, %190 : vector<8x128xf32>
    %cst_25 = arith.constant 0.000000e+00 : f32
    %192 = arith.subf %cst_25, %182 : f32
    %193 = vector.broadcast %182 : f32 to vector<8x128xf32>
    %194 = arith.mulf %27, %193 : vector<8x128xf32>
    %195 = vector.broadcast %182 : f32 to vector<8x128xf32>
    %196 = arith.mulf %26, %195 : vector<8x128xf32>
    %cst_26 = arith.constant 0.000000e+00 : f32
    %197 = arith.subf %cst_26, %184 : f32
    %198 = arith.mulf %110, %26 : vector<8x128xf32>
    %199 = arith.mulf %115, %189 : vector<8x128xf32>
    %200 = arith.mulf %120, %194 : vector<8x128xf32>
    %201 = arith.addf %198, %199 : vector<8x128xf32>
    %202 = arith.addf %201, %200 : vector<8x128xf32>
    %203 = arith.mulf %110, %187 : vector<8x128xf32>
    %204 = arith.mulf %115, %191 : vector<8x128xf32>
    %205 = arith.mulf %120, %196 : vector<8x128xf32>
    %206 = arith.addf %203, %204 : vector<8x128xf32>
    %207 = arith.addf %206, %205 : vector<8x128xf32>
    %208 = vector.broadcast %192 : f32 to vector<8x128xf32>
    %209 = arith.mulf %115, %208 : vector<8x128xf32>
    %210 = vector.broadcast %181 : f32 to vector<8x128xf32>
    %211 = arith.mulf %120, %210 : vector<8x128xf32>
    %212 = arith.addf %209, %211 : vector<8x128xf32>
    %213 = arith.mulf %125, %26 : vector<8x128xf32>
    %214 = arith.mulf %130, %189 : vector<8x128xf32>
    %215 = arith.mulf %135, %194 : vector<8x128xf32>
    %216 = arith.addf %213, %214 : vector<8x128xf32>
    %217 = arith.addf %216, %215 : vector<8x128xf32>
    %218 = arith.mulf %125, %187 : vector<8x128xf32>
    %219 = arith.mulf %130, %191 : vector<8x128xf32>
    %220 = arith.mulf %135, %196 : vector<8x128xf32>
    %221 = arith.addf %218, %219 : vector<8x128xf32>
    %222 = arith.addf %221, %220 : vector<8x128xf32>
    %223 = vector.broadcast %192 : f32 to vector<8x128xf32>
    %224 = arith.mulf %130, %223 : vector<8x128xf32>
    %225 = vector.broadcast %181 : f32 to vector<8x128xf32>
    %226 = arith.mulf %135, %225 : vector<8x128xf32>
    %227 = arith.addf %224, %226 : vector<8x128xf32>
    %228 = arith.mulf %141, %26 : vector<8x128xf32>
    %229 = arith.mulf %147, %189 : vector<8x128xf32>
    %230 = arith.mulf %152, %194 : vector<8x128xf32>
    %231 = arith.addf %228, %229 : vector<8x128xf32>
    %232 = arith.addf %231, %230 : vector<8x128xf32>
    %233 = arith.mulf %141, %187 : vector<8x128xf32>
    %234 = arith.mulf %147, %191 : vector<8x128xf32>
    %235 = arith.mulf %152, %196 : vector<8x128xf32>
    %236 = arith.addf %233, %234 : vector<8x128xf32>
    %237 = arith.addf %236, %235 : vector<8x128xf32>
    %238 = vector.broadcast %192 : f32 to vector<8x128xf32>
    %239 = arith.mulf %147, %238 : vector<8x128xf32>
    %240 = vector.broadcast %181 : f32 to vector<8x128xf32>
    %241 = arith.mulf %152, %240 : vector<8x128xf32>
    %242 = arith.addf %239, %241 : vector<8x128xf32>
    %243 = vector.broadcast %183 : f32 to vector<8x128xf32>
    %244 = arith.mulf %110, %243 : vector<8x128xf32>
    %245 = vector.broadcast %197 : f32 to vector<8x128xf32>
    %246 = arith.mulf %115, %245 : vector<8x128xf32>
    %247 = vector.broadcast %185 : f32 to vector<8x128xf32>
    %248 = arith.mulf %120, %247 : vector<8x128xf32>
    %249 = arith.addf %244, %246 : vector<8x128xf32>
    %250 = arith.addf %249, %248 : vector<8x128xf32>
    %251 = arith.addf %250, %161 : vector<8x128xf32>
    %252 = vector.broadcast %183 : f32 to vector<8x128xf32>
    %253 = arith.mulf %125, %252 : vector<8x128xf32>
    %254 = vector.broadcast %197 : f32 to vector<8x128xf32>
    %255 = arith.mulf %130, %254 : vector<8x128xf32>
    %256 = vector.broadcast %185 : f32 to vector<8x128xf32>
    %257 = arith.mulf %135, %256 : vector<8x128xf32>
    %258 = arith.addf %253, %255 : vector<8x128xf32>
    %259 = arith.addf %258, %257 : vector<8x128xf32>
    %260 = arith.addf %259, %170 : vector<8x128xf32>
    %261 = vector.broadcast %183 : f32 to vector<8x128xf32>
    %262 = arith.mulf %141, %261 : vector<8x128xf32>
    %263 = vector.broadcast %197 : f32 to vector<8x128xf32>
    %264 = arith.mulf %147, %263 : vector<8x128xf32>
    %265 = vector.broadcast %185 : f32 to vector<8x128xf32>
    %266 = arith.mulf %152, %265 : vector<8x128xf32>
    %267 = arith.addf %262, %264 : vector<8x128xf32>
    %268 = arith.addf %267, %266 : vector<8x128xf32>
    %269 = arith.addf %268, %180 : vector<8x128xf32>
    %c16 = arith.constant 16 : index
    %270 = memref.load %arg1[%c16] : memref<54xf32, #tpu.memory_space<smem>>
    %c17 = arith.constant 17 : index
    %271 = memref.load %arg1[%c17] : memref<54xf32, #tpu.memory_space<smem>>
    %c18 = arith.constant 18 : index
    %272 = memref.load %arg1[%c18] : memref<54xf32, #tpu.memory_space<smem>>
    %c19 = arith.constant 19 : index
    %273 = memref.load %arg1[%c19] : memref<54xf32, #tpu.memory_space<smem>>
    %c20 = arith.constant 20 : index
    %274 = memref.load %arg1[%c20] : memref<54xf32, #tpu.memory_space<smem>>
    %cst_27 = arith.constant 0.000000e+00 : f32
    %275 = vector.broadcast %cst_27 : f32 to vector<8x128xf32>
    %276 = arith.subf %275, %34 : vector<8x128xf32>
    %277 = vector.broadcast %270 : f32 to vector<8x128xf32>
    %278 = arith.mulf %34, %277 : vector<8x128xf32>
    %279 = vector.broadcast %270 : f32 to vector<8x128xf32>
    %280 = arith.mulf %33, %279 : vector<8x128xf32>
    %cst_28 = arith.constant 0.000000e+00 : f32
    %281 = arith.subf %cst_28, %271 : f32
    %282 = vector.broadcast %271 : f32 to vector<8x128xf32>
    %283 = arith.mulf %34, %282 : vector<8x128xf32>
    %284 = vector.broadcast %271 : f32 to vector<8x128xf32>
    %285 = arith.mulf %33, %284 : vector<8x128xf32>
    %cst_29 = arith.constant 0.000000e+00 : f32
    %286 = arith.subf %cst_29, %273 : f32
    %287 = arith.mulf %202, %33 : vector<8x128xf32>
    %288 = arith.mulf %207, %278 : vector<8x128xf32>
    %289 = arith.mulf %212, %283 : vector<8x128xf32>
    %290 = arith.addf %287, %288 : vector<8x128xf32>
    %291 = arith.addf %290, %289 : vector<8x128xf32>
    %292 = arith.mulf %202, %276 : vector<8x128xf32>
    %293 = arith.mulf %207, %280 : vector<8x128xf32>
    %294 = arith.mulf %212, %285 : vector<8x128xf32>
    %295 = arith.addf %292, %293 : vector<8x128xf32>
    %296 = arith.addf %295, %294 : vector<8x128xf32>
    %297 = vector.broadcast %281 : f32 to vector<8x128xf32>
    %298 = arith.mulf %207, %297 : vector<8x128xf32>
    %299 = vector.broadcast %270 : f32 to vector<8x128xf32>
    %300 = arith.mulf %212, %299 : vector<8x128xf32>
    %301 = arith.addf %298, %300 : vector<8x128xf32>
    %302 = arith.mulf %217, %33 : vector<8x128xf32>
    %303 = arith.mulf %222, %278 : vector<8x128xf32>
    %304 = arith.mulf %227, %283 : vector<8x128xf32>
    %305 = arith.addf %302, %303 : vector<8x128xf32>
    %306 = arith.addf %305, %304 : vector<8x128xf32>
    %307 = arith.mulf %217, %276 : vector<8x128xf32>
    %308 = arith.mulf %222, %280 : vector<8x128xf32>
    %309 = arith.mulf %227, %285 : vector<8x128xf32>
    %310 = arith.addf %307, %308 : vector<8x128xf32>
    %311 = arith.addf %310, %309 : vector<8x128xf32>
    %312 = vector.broadcast %281 : f32 to vector<8x128xf32>
    %313 = arith.mulf %222, %312 : vector<8x128xf32>
    %314 = vector.broadcast %270 : f32 to vector<8x128xf32>
    %315 = arith.mulf %227, %314 : vector<8x128xf32>
    %316 = arith.addf %313, %315 : vector<8x128xf32>
    %317 = arith.mulf %232, %33 : vector<8x128xf32>
    %318 = arith.mulf %237, %278 : vector<8x128xf32>
    %319 = arith.mulf %242, %283 : vector<8x128xf32>
    %320 = arith.addf %317, %318 : vector<8x128xf32>
    %321 = arith.addf %320, %319 : vector<8x128xf32>
    %322 = arith.mulf %232, %276 : vector<8x128xf32>
    %323 = arith.mulf %237, %280 : vector<8x128xf32>
    %324 = arith.mulf %242, %285 : vector<8x128xf32>
    %325 = arith.addf %322, %323 : vector<8x128xf32>
    %326 = arith.addf %325, %324 : vector<8x128xf32>
    %327 = vector.broadcast %281 : f32 to vector<8x128xf32>
    %328 = arith.mulf %237, %327 : vector<8x128xf32>
    %329 = vector.broadcast %270 : f32 to vector<8x128xf32>
    %330 = arith.mulf %242, %329 : vector<8x128xf32>
    %331 = arith.addf %328, %330 : vector<8x128xf32>
    %332 = vector.broadcast %272 : f32 to vector<8x128xf32>
    %333 = arith.mulf %202, %332 : vector<8x128xf32>
    %334 = vector.broadcast %286 : f32 to vector<8x128xf32>
    %335 = arith.mulf %207, %334 : vector<8x128xf32>
    %336 = vector.broadcast %274 : f32 to vector<8x128xf32>
    %337 = arith.mulf %212, %336 : vector<8x128xf32>
    %338 = arith.addf %333, %335 : vector<8x128xf32>
    %339 = arith.addf %338, %337 : vector<8x128xf32>
    %340 = arith.addf %339, %251 : vector<8x128xf32>
    %341 = vector.broadcast %272 : f32 to vector<8x128xf32>
    %342 = arith.mulf %217, %341 : vector<8x128xf32>
    %343 = vector.broadcast %286 : f32 to vector<8x128xf32>
    %344 = arith.mulf %222, %343 : vector<8x128xf32>
    %345 = vector.broadcast %274 : f32 to vector<8x128xf32>
    %346 = arith.mulf %227, %345 : vector<8x128xf32>
    %347 = arith.addf %342, %344 : vector<8x128xf32>
    %348 = arith.addf %347, %346 : vector<8x128xf32>
    %349 = arith.addf %348, %260 : vector<8x128xf32>
    %350 = vector.broadcast %272 : f32 to vector<8x128xf32>
    %351 = arith.mulf %232, %350 : vector<8x128xf32>
    %352 = vector.broadcast %286 : f32 to vector<8x128xf32>
    %353 = arith.mulf %237, %352 : vector<8x128xf32>
    %354 = vector.broadcast %274 : f32 to vector<8x128xf32>
    %355 = arith.mulf %242, %354 : vector<8x128xf32>
    %356 = arith.addf %351, %353 : vector<8x128xf32>
    %357 = arith.addf %356, %355 : vector<8x128xf32>
    %358 = arith.addf %357, %269 : vector<8x128xf32>
    %c21 = arith.constant 21 : index
    %359 = memref.load %arg1[%c21] : memref<54xf32, #tpu.memory_space<smem>>
    %360 = vector.broadcast %359 : f32 to vector<8x128xf32>
    %361 = arith.mulf %360, %40 : vector<8x128xf32>
    %c30 = arith.constant 30 : index
    %362 = memref.load %arg1[%c30] : memref<54xf32, #tpu.memory_space<smem>>
    %363 = vector.broadcast %362 : f32 to vector<8x128xf32>
    %364 = arith.mulf %363, %41 : vector<8x128xf32>
    %365 = arith.addf %361, %364 : vector<8x128xf32>
    %c22 = arith.constant 22 : index
    %366 = memref.load %arg1[%c22] : memref<54xf32, #tpu.memory_space<smem>>
    %367 = vector.broadcast %366 : f32 to vector<8x128xf32>
    %368 = arith.mulf %367, %40 : vector<8x128xf32>
    %c31 = arith.constant 31 : index
    %369 = memref.load %arg1[%c31] : memref<54xf32, #tpu.memory_space<smem>>
    %370 = vector.broadcast %369 : f32 to vector<8x128xf32>
    %371 = arith.mulf %370, %41 : vector<8x128xf32>
    %372 = arith.addf %368, %371 : vector<8x128xf32>
    %c23 = arith.constant 23 : index
    %373 = memref.load %arg1[%c23] : memref<54xf32, #tpu.memory_space<smem>>
    %374 = vector.broadcast %373 : f32 to vector<8x128xf32>
    %375 = arith.mulf %374, %40 : vector<8x128xf32>
    %c32 = arith.constant 32 : index
    %376 = memref.load %arg1[%c32] : memref<54xf32, #tpu.memory_space<smem>>
    %377 = vector.broadcast %376 : f32 to vector<8x128xf32>
    %378 = arith.mulf %377, %41 : vector<8x128xf32>
    %379 = arith.addf %375, %378 : vector<8x128xf32>
    %c24 = arith.constant 24 : index
    %380 = memref.load %arg1[%c24] : memref<54xf32, #tpu.memory_space<smem>>
    %381 = vector.broadcast %380 : f32 to vector<8x128xf32>
    %382 = arith.mulf %381, %40 : vector<8x128xf32>
    %c33 = arith.constant 33 : index
    %383 = memref.load %arg1[%c33] : memref<54xf32, #tpu.memory_space<smem>>
    %384 = vector.broadcast %383 : f32 to vector<8x128xf32>
    %385 = arith.mulf %384, %41 : vector<8x128xf32>
    %386 = arith.addf %382, %385 : vector<8x128xf32>
    %c39 = arith.constant 39 : index
    %387 = memref.load %arg1[%c39] : memref<54xf32, #tpu.memory_space<smem>>
    %388 = vector.broadcast %387 : f32 to vector<8x128xf32>
    %389 = arith.addf %386, %388 : vector<8x128xf32>
    %c25 = arith.constant 25 : index
    %390 = memref.load %arg1[%c25] : memref<54xf32, #tpu.memory_space<smem>>
    %391 = vector.broadcast %390 : f32 to vector<8x128xf32>
    %392 = arith.mulf %391, %40 : vector<8x128xf32>
    %c34 = arith.constant 34 : index
    %393 = memref.load %arg1[%c34] : memref<54xf32, #tpu.memory_space<smem>>
    %394 = vector.broadcast %393 : f32 to vector<8x128xf32>
    %395 = arith.mulf %394, %41 : vector<8x128xf32>
    %396 = arith.addf %392, %395 : vector<8x128xf32>
    %c40 = arith.constant 40 : index
    %397 = memref.load %arg1[%c40] : memref<54xf32, #tpu.memory_space<smem>>
    %398 = vector.broadcast %397 : f32 to vector<8x128xf32>
    %399 = arith.addf %396, %398 : vector<8x128xf32>
    %c26 = arith.constant 26 : index
    %400 = memref.load %arg1[%c26] : memref<54xf32, #tpu.memory_space<smem>>
    %401 = vector.broadcast %400 : f32 to vector<8x128xf32>
    %402 = arith.mulf %401, %40 : vector<8x128xf32>
    %c35 = arith.constant 35 : index
    %403 = memref.load %arg1[%c35] : memref<54xf32, #tpu.memory_space<smem>>
    %404 = vector.broadcast %403 : f32 to vector<8x128xf32>
    %405 = arith.mulf %404, %41 : vector<8x128xf32>
    %406 = arith.addf %402, %405 : vector<8x128xf32>
    %c41 = arith.constant 41 : index
    %407 = memref.load %arg1[%c41] : memref<54xf32, #tpu.memory_space<smem>>
    %408 = vector.broadcast %407 : f32 to vector<8x128xf32>
    %409 = arith.addf %406, %408 : vector<8x128xf32>
    %c27 = arith.constant 27 : index
    %410 = memref.load %arg1[%c27] : memref<54xf32, #tpu.memory_space<smem>>
    %411 = vector.broadcast %410 : f32 to vector<8x128xf32>
    %412 = arith.mulf %411, %40 : vector<8x128xf32>
    %c36 = arith.constant 36 : index
    %413 = memref.load %arg1[%c36] : memref<54xf32, #tpu.memory_space<smem>>
    %414 = vector.broadcast %413 : f32 to vector<8x128xf32>
    %415 = arith.mulf %414, %41 : vector<8x128xf32>
    %416 = arith.addf %412, %415 : vector<8x128xf32>
    %c42 = arith.constant 42 : index
    %417 = memref.load %arg1[%c42] : memref<54xf32, #tpu.memory_space<smem>>
    %418 = vector.broadcast %417 : f32 to vector<8x128xf32>
    %419 = arith.addf %416, %418 : vector<8x128xf32>
    %c28 = arith.constant 28 : index
    %420 = memref.load %arg1[%c28] : memref<54xf32, #tpu.memory_space<smem>>
    %421 = vector.broadcast %420 : f32 to vector<8x128xf32>
    %422 = arith.mulf %421, %40 : vector<8x128xf32>
    %c37 = arith.constant 37 : index
    %423 = memref.load %arg1[%c37] : memref<54xf32, #tpu.memory_space<smem>>
    %424 = vector.broadcast %423 : f32 to vector<8x128xf32>
    %425 = arith.mulf %424, %41 : vector<8x128xf32>
    %426 = arith.addf %422, %425 : vector<8x128xf32>
    %c43 = arith.constant 43 : index
    %427 = memref.load %arg1[%c43] : memref<54xf32, #tpu.memory_space<smem>>
    %428 = vector.broadcast %427 : f32 to vector<8x128xf32>
    %429 = arith.addf %426, %428 : vector<8x128xf32>
    %c29 = arith.constant 29 : index
    %430 = memref.load %arg1[%c29] : memref<54xf32, #tpu.memory_space<smem>>
    %431 = vector.broadcast %430 : f32 to vector<8x128xf32>
    %432 = arith.mulf %431, %40 : vector<8x128xf32>
    %c38 = arith.constant 38 : index
    %433 = memref.load %arg1[%c38] : memref<54xf32, #tpu.memory_space<smem>>
    %434 = vector.broadcast %433 : f32 to vector<8x128xf32>
    %435 = arith.mulf %434, %41 : vector<8x128xf32>
    %436 = arith.addf %432, %435 : vector<8x128xf32>
    %c44 = arith.constant 44 : index
    %437 = memref.load %arg1[%c44] : memref<54xf32, #tpu.memory_space<smem>>
    %438 = vector.broadcast %437 : f32 to vector<8x128xf32>
    %439 = arith.addf %436, %438 : vector<8x128xf32>
    %c45 = arith.constant 45 : index
    %440 = memref.load %arg1[%c45] : memref<54xf32, #tpu.memory_space<smem>>
    %c46 = arith.constant 46 : index
    %441 = memref.load %arg1[%c46] : memref<54xf32, #tpu.memory_space<smem>>
    %c47 = arith.constant 47 : index
    %442 = memref.load %arg1[%c47] : memref<54xf32, #tpu.memory_space<smem>>
    %443 = arith.mulf %291, %365 : vector<8x128xf32>
    %444 = arith.mulf %296, %389 : vector<8x128xf32>
    %445 = arith.mulf %301, %419 : vector<8x128xf32>
    %446 = arith.addf %443, %444 : vector<8x128xf32>
    %447 = arith.addf %446, %445 : vector<8x128xf32>
    %448 = arith.mulf %291, %372 : vector<8x128xf32>
    %449 = arith.mulf %296, %399 : vector<8x128xf32>
    %450 = arith.mulf %301, %429 : vector<8x128xf32>
    %451 = arith.addf %448, %449 : vector<8x128xf32>
    %452 = arith.addf %451, %450 : vector<8x128xf32>
    %453 = arith.mulf %291, %379 : vector<8x128xf32>
    %454 = arith.mulf %296, %409 : vector<8x128xf32>
    %455 = arith.mulf %301, %439 : vector<8x128xf32>
    %456 = arith.addf %453, %454 : vector<8x128xf32>
    %457 = arith.addf %456, %455 : vector<8x128xf32>
    %458 = arith.mulf %306, %365 : vector<8x128xf32>
    %459 = arith.mulf %311, %389 : vector<8x128xf32>
    %460 = arith.mulf %316, %419 : vector<8x128xf32>
    %461 = arith.addf %458, %459 : vector<8x128xf32>
    %462 = arith.addf %461, %460 : vector<8x128xf32>
    %463 = arith.mulf %306, %372 : vector<8x128xf32>
    %464 = arith.mulf %311, %399 : vector<8x128xf32>
    %465 = arith.mulf %316, %429 : vector<8x128xf32>
    %466 = arith.addf %463, %464 : vector<8x128xf32>
    %467 = arith.addf %466, %465 : vector<8x128xf32>
    %468 = arith.mulf %306, %379 : vector<8x128xf32>
    %469 = arith.mulf %311, %409 : vector<8x128xf32>
    %470 = arith.mulf %316, %439 : vector<8x128xf32>
    %471 = arith.addf %468, %469 : vector<8x128xf32>
    %472 = arith.addf %471, %470 : vector<8x128xf32>
    %473 = arith.mulf %321, %365 : vector<8x128xf32>
    %474 = arith.mulf %326, %389 : vector<8x128xf32>
    %475 = arith.mulf %331, %419 : vector<8x128xf32>
    %476 = arith.addf %473, %474 : vector<8x128xf32>
    %477 = arith.addf %476, %475 : vector<8x128xf32>
    %478 = arith.mulf %321, %372 : vector<8x128xf32>
    %479 = arith.mulf %326, %399 : vector<8x128xf32>
    %480 = arith.mulf %331, %429 : vector<8x128xf32>
    %481 = arith.addf %478, %479 : vector<8x128xf32>
    %482 = arith.addf %481, %480 : vector<8x128xf32>
    %483 = arith.mulf %321, %379 : vector<8x128xf32>
    %484 = arith.mulf %326, %409 : vector<8x128xf32>
    %485 = arith.mulf %331, %439 : vector<8x128xf32>
    %486 = arith.addf %483, %484 : vector<8x128xf32>
    %487 = arith.addf %486, %485 : vector<8x128xf32>
    %488 = vector.broadcast %440 : f32 to vector<8x128xf32>
    %489 = arith.mulf %291, %488 : vector<8x128xf32>
    %490 = vector.broadcast %441 : f32 to vector<8x128xf32>
    %491 = arith.mulf %296, %490 : vector<8x128xf32>
    %492 = vector.broadcast %442 : f32 to vector<8x128xf32>
    %493 = arith.mulf %301, %492 : vector<8x128xf32>
    %494 = arith.addf %489, %491 : vector<8x128xf32>
    %495 = arith.addf %494, %493 : vector<8x128xf32>
    %496 = arith.addf %495, %340 : vector<8x128xf32>
    %497 = vector.broadcast %440 : f32 to vector<8x128xf32>
    %498 = arith.mulf %306, %497 : vector<8x128xf32>
    %499 = vector.broadcast %441 : f32 to vector<8x128xf32>
    %500 = arith.mulf %311, %499 : vector<8x128xf32>
    %501 = vector.broadcast %442 : f32 to vector<8x128xf32>
    %502 = arith.mulf %316, %501 : vector<8x128xf32>
    %503 = arith.addf %498, %500 : vector<8x128xf32>
    %504 = arith.addf %503, %502 : vector<8x128xf32>
    %505 = arith.addf %504, %349 : vector<8x128xf32>
    %506 = vector.broadcast %440 : f32 to vector<8x128xf32>
    %507 = arith.mulf %321, %506 : vector<8x128xf32>
    %508 = vector.broadcast %441 : f32 to vector<8x128xf32>
    %509 = arith.mulf %326, %508 : vector<8x128xf32>
    %510 = vector.broadcast %442 : f32 to vector<8x128xf32>
    %511 = arith.mulf %331, %510 : vector<8x128xf32>
    %512 = arith.addf %507, %509 : vector<8x128xf32>
    %513 = arith.addf %512, %511 : vector<8x128xf32>
    %514 = arith.addf %513, %358 : vector<8x128xf32>
    %c0_30 = arith.constant 0 : index
    %c0_31 = arith.constant 0 : index
    %c0_32 = arith.constant 0 : index
    %515 = vector.load %arg3[%c0_30, %c0_31, %c0_32] : memref<12x8x128xf32, #tpu.memory_space<vmem>>, vector<1x8x128xf32>
    %516 = vector.shape_cast %515 : vector<1x8x128xf32> to vector<8x128xf32>
    %517 = vector.shape_cast %447 : vector<8x128xf32> to vector<1x8x128xf32>
    tpu.vector_store %arg3[%c0_30, %c0_31, %c0_32], %517 {strides = array<i32>} : memref<12x8x128xf32, #tpu.memory_space<vmem>>, vector<1x8x128xf32>,
    %c1_33 = arith.constant 1 : index
    %c0_34 = arith.constant 0 : index
    %c0_35 = arith.constant 0 : index
    %518 = vector.load %arg3[%c1_33, %c0_34, %c0_35] : memref<12x8x128xf32, #tpu.memory_space<vmem>>, vector<1x8x128xf32>
    %519 = vector.shape_cast %518 : vector<1x8x128xf32> to vector<8x128xf32>
    %520 = vector.shape_cast %452 : vector<8x128xf32> to vector<1x8x128xf32>
    tpu.vector_store %arg3[%c1_33, %c0_34, %c0_35], %520 {strides = array<i32>} : memref<12x8x128xf32, #tpu.memory_space<vmem>>, vector<1x8x128xf32>,
    %c2_36 = arith.constant 2 : index
    %c0_37 = arith.constant 0 : index
    %c0_38 = arith.constant 0 : index
    %521 = vector.load %arg3[%c2_36, %c0_37, %c0_38] : memref<12x8x128xf32, #tpu.memory_space<vmem>>, vector<1x8x128xf32>
    %522 = vector.shape_cast %521 : vector<1x8x128xf32> to vector<8x128xf32>
    %523 = vector.shape_cast %457 : vector<8x128xf32> to vector<1x8x128xf32>
    tpu.vector_store %arg3[%c2_36, %c0_37, %c0_38], %523 {strides = array<i32>} : memref<12x8x128xf32, #tpu.memory_space<vmem>>, vector<1x8x128xf32>,
    %c3_39 = arith.constant 3 : index
    %c0_40 = arith.constant 0 : index
    %c0_41 = arith.constant 0 : index
    %524 = vector.load %arg3[%c3_39, %c0_40, %c0_41] : memref<12x8x128xf32, #tpu.memory_space<vmem>>, vector<1x8x128xf32>
    %525 = vector.shape_cast %524 : vector<1x8x128xf32> to vector<8x128xf32>
    %526 = vector.shape_cast %462 : vector<8x128xf32> to vector<1x8x128xf32>
    tpu.vector_store %arg3[%c3_39, %c0_40, %c0_41], %526 {strides = array<i32>} : memref<12x8x128xf32, #tpu.memory_space<vmem>>, vector<1x8x128xf32>,
    %c4_42 = arith.constant 4 : index
    %c0_43 = arith.constant 0 : index
    %c0_44 = arith.constant 0 : index
    %527 = vector.load %arg3[%c4_42, %c0_43, %c0_44] : memref<12x8x128xf32, #tpu.memory_space<vmem>>, vector<1x8x128xf32>
    %528 = vector.shape_cast %527 : vector<1x8x128xf32> to vector<8x128xf32>
    %529 = vector.shape_cast %467 : vector<8x128xf32> to vector<1x8x128xf32>
    tpu.vector_store %arg3[%c4_42, %c0_43, %c0_44], %529 {strides = array<i32>} : memref<12x8x128xf32, #tpu.memory_space<vmem>>, vector<1x8x128xf32>,
    %c5_45 = arith.constant 5 : index
    %c0_46 = arith.constant 0 : index
    %c0_47 = arith.constant 0 : index
    %530 = vector.load %arg3[%c5_45, %c0_46, %c0_47] : memref<12x8x128xf32, #tpu.memory_space<vmem>>, vector<1x8x128xf32>
    %531 = vector.shape_cast %530 : vector<1x8x128xf32> to vector<8x128xf32>
    %532 = vector.shape_cast %472 : vector<8x128xf32> to vector<1x8x128xf32>
    tpu.vector_store %arg3[%c5_45, %c0_46, %c0_47], %532 {strides = array<i32>} : memref<12x8x128xf32, #tpu.memory_space<vmem>>, vector<1x8x128xf32>,
    %c6_48 = arith.constant 6 : index
    %c0_49 = arith.constant 0 : index
    %c0_50 = arith.constant 0 : index
    %533 = vector.load %arg3[%c6_48, %c0_49, %c0_50] : memref<12x8x128xf32, #tpu.memory_space<vmem>>, vector<1x8x128xf32>
    %534 = vector.shape_cast %533 : vector<1x8x128xf32> to vector<8x128xf32>
    %535 = vector.shape_cast %477 : vector<8x128xf32> to vector<1x8x128xf32>
    tpu.vector_store %arg3[%c6_48, %c0_49, %c0_50], %535 {strides = array<i32>} : memref<12x8x128xf32, #tpu.memory_space<vmem>>, vector<1x8x128xf32>,
    %c7_51 = arith.constant 7 : index
    %c0_52 = arith.constant 0 : index
    %c0_53 = arith.constant 0 : index
    %536 = vector.load %arg3[%c7_51, %c0_52, %c0_53] : memref<12x8x128xf32, #tpu.memory_space<vmem>>, vector<1x8x128xf32>
    %537 = vector.shape_cast %536 : vector<1x8x128xf32> to vector<8x128xf32>
    %538 = vector.shape_cast %482 : vector<8x128xf32> to vector<1x8x128xf32>
    tpu.vector_store %arg3[%c7_51, %c0_52, %c0_53], %538 {strides = array<i32>} : memref<12x8x128xf32, #tpu.memory_space<vmem>>, vector<1x8x128xf32>,
    %c8_54 = arith.constant 8 : index
    %c0_55 = arith.constant 0 : index
    %c0_56 = arith.constant 0 : index
    %539 = vector.load %arg3[%c8_54, %c0_55, %c0_56] : memref<12x8x128xf32, #tpu.memory_space<vmem>>, vector<1x8x128xf32>
    %540 = vector.shape_cast %539 : vector<1x8x128xf32> to vector<8x128xf32>
    %541 = vector.shape_cast %487 : vector<8x128xf32> to vector<1x8x128xf32>
    tpu.vector_store %arg3[%c8_54, %c0_55, %c0_56], %541 {strides = array<i32>} : memref<12x8x128xf32, #tpu.memory_space<vmem>>, vector<1x8x128xf32>,
    %c9_57 = arith.constant 9 : index
    %c0_58 = arith.constant 0 : index
    %c0_59 = arith.constant 0 : index
    %542 = vector.load %arg3[%c9_57, %c0_58, %c0_59] : memref<12x8x128xf32, #tpu.memory_space<vmem>>, vector<1x8x128xf32>
    %543 = vector.shape_cast %542 : vector<1x8x128xf32> to vector<8x128xf32>
    %544 = vector.shape_cast %496 : vector<8x128xf32> to vector<1x8x128xf32>
    tpu.vector_store %arg3[%c9_57, %c0_58, %c0_59], %544 {strides = array<i32>} : memref<12x8x128xf32, #tpu.memory_space<vmem>>, vector<1x8x128xf32>,
    %c10_60 = arith.constant 10 : index
    %c0_61 = arith.constant 0 : index
    %c0_62 = arith.constant 0 : index
    %545 = vector.load %arg3[%c10_60, %c0_61, %c0_62] : memref<12x8x128xf32, #tpu.memory_space<vmem>>, vector<1x8x128xf32>
    %546 = vector.shape_cast %545 : vector<1x8x128xf32> to vector<8x128xf32>
    %547 = vector.shape_cast %505 : vector<8x128xf32> to vector<1x8x128xf32>
    tpu.vector_store %arg3[%c10_60, %c0_61, %c0_62], %547 {strides = array<i32>} : memref<12x8x128xf32, #tpu.memory_space<vmem>>, vector<1x8x128xf32>,
    %c11_63 = arith.constant 11 : index
    %c0_64 = arith.constant 0 : index
    %c0_65 = arith.constant 0 : index
    %548 = vector.load %arg3[%c11_63, %c0_64, %c0_65] : memref<12x8x128xf32, #tpu.memory_space<vmem>>, vector<1x8x128xf32>
    %549 = vector.shape_cast %548 : vector<1x8x128xf32> to vector<8x128xf32>
    %550 = vector.shape_cast %514 : vector<8x128xf32> to vector<1x8x128xf32>
    tpu.vector_store %arg3[%c11_63, %c0_64, %c0_65], %550 {strides = array<i32>} : memref<12x8x128xf32, #tpu.memory_space<vmem>>, vector<1x8x128xf32>,
    return
  }
  func.func @transform_0(%arg0: i32) -> i32 {
    %c0_i32 = arith.constant 0 : i32
    %c0_i32_0 = arith.constant 0 : i32
    return %c0_i32 : i32
  }
  func.func @transform_1(%arg0: i32) -> (i32, i32, i32) {
    %c0_i32 = arith.constant 0 : i32
    %c0_i32_0 = arith.constant 0 : i32
    %c0_i32_1 = arith.constant 0 : i32
    return %c0_i32, %arg0, %c0_i32_0 : i32, i32, i32
  }
  func.func @transform_2(%arg0: i32) -> (i32, i32, i32) {
    %c0_i32 = arith.constant 0 : i32
    %c0_i32_0 = arith.constant 0 : i32
    %c0_i32_1 = arith.constant 0 : i32
    return %c0_i32, %arg0, %c0_i32_0 : i32, i32, i32
  }
}

</mosaic_0001>

<bundles_post_ra>
// kernel: tpu_custom_call.1
= control target key start
LH: loop header
LB: loop body
LE: loop exit
PB: predicated region body
PF: predicated region fallthrough
CT: control target
= control target key end

     0   :  { %7 = vsyncpa [#allocation5], 0  ;;  %s3243_s0 = inlined_call_operand.hbm [shape: f32[54], index: 0, kind: input, shape index: {}]   ;;  %s3244_s1 = inlined_call_operand.hbm [shape: f32[6,8,128], index: 1, kind: input, shape index: {}]   ;;  %s3245_s2 = inlined_call_operand.hbm [shape: f32[12,8,128], index: 2, kind: output, shape index: {}]  }
   0x1   :  { %8 = vsyncpa [#allocation3], 0 }
   0x2   :  { %9 = vsyncpa [#allocation4], 0  ;;  %s1927_s11 = scalar_lea.hbm %s3243_s0, 16 }
   0x3   :  { %p1928_p0 = scmp.ne.s32.totalorder %s3243_s0, %s1927_s11  ;;  %p1931_p1 = scmp.lt.u32.totalorder %s1927_s11, %s3243_s0 }
   0x5   :  { %p1933_p2 = pnand %p1931_p1, %p1928_p0 }
   0x7   :  { %1936 = shalt.err (!%p1933_p2)
}
   0x8   :  { %s1987_s16 = smov [#allocation2]   ;;  %s1988_s19 = smov [#allocation6]  }
   0x9   :  { %17 = dma.hbm_to_smem %s3243_s0, 16, %s1987_s16, [#allocation5]  }
   0xa   :  { %s23_s20 = sshll.u32 %s1988_s19, 4  ;;  %s1937_s23 = scalar_lea.hbm %s3244_s1, 768  ;;  %s24_s20 = int_to_ptr.vmem [resolvable:$true] %s23_s20 }
   0xb   :  { %p1938_p3 = scmp.ne.s32.totalorder %s3244_s1, %s1937_s23  ;;  %p1941_p4 = scmp.lt.u32.totalorder %s1937_s23, %s3244_s1 }
   0xd   :  { %p1943_p5 = pnand %p1941_p4, %p1938_p3 }
   0xf   :  { %1946 = shalt.err (!%p1943_p5)
}
  0x10   :  { %s1947_s28 = scalar_lea.vmem %s24_s20, 768  ;;  %p1952_p7 = scmp.lt.s32.totalorder %s24_s20, %s24_s20 }
  0x11   :  { %p1948_p6 = scmp.ne.s32.totalorder %s24_s20, %s1947_s28  ;;  %p1953_p8 = scmp.lt.s32.totalorder %s1947_s28, %s1947_s28 }
  0x13   :  { %p1954_p9 = por %p1953_p8, %p1952_p7 }
  0x15   :  { %p1955_p10 = pnand %p1954_p9, %p1948_p6 }
  0x17   :  { %1958 = shalt.err (!%p1955_p10)
}
  0x18   :  { %s1989_s0 = smov 128   ;;  %s1990_s29 = smov 8  }
  0x19   :  { %29 = dma.hbm_to_vmem [thread:$0]  %s3244_s1, 768, %s24_s20, [#allocation3], %s1989_s0, %s1989_s0, %s1990_s29  }
  0x1a   :  { %1981 = dma.done.wait [#allocation5], 16  }
  0x1b   :  { %1982 = vsyncadd [#allocation5], 4294967280 }
  0x1c   :  { %1983 = dma.done.wait [#allocation3], 768  }
  0x1d   :  { %1984 = vsyncadd [#allocation3], 4294966528 }
  0x1e   :  { %36 = sfence }
  0x1f   :  { %s1767_s4 = sld [smem:[#allocation2 + $0x30]]  ;;  %s1776_s5 = sld [smem:[#allocation2 + $0x31]]  ;;  %v37_v0 = vld [vmem:[#allocation6] sm:$0xff]  ;;  %v249_v3 = vld [vmem:[#allocation6 + $0x8] sm:$0xff]  ;;  %v461_v5 = vld [vmem:[#allocation6 + $0x10] sm:$0xff] }
  0x20   :  { %s1785_s6 = sld [smem:[#allocation2 + $0x32]]  ;;  %v1991_v32 = vmov 683565275   ;;  %v1992_v34 = vmov 2475754826   ;;  %s2125_s1 = sld [smem:[#allocation2 + $0x33]] }
  0x21   :  { %v1993_v36 = vmov 2131351028   ;;  %v1994_v38 = vmov 2102212464   ;;  %v1995_v40 = vmov 920167782  }
  0x22   :  { %v1996_v47 = vmov 1326507024   ;;  %s2172_s7 = sld [smem:[#allocation2 + $0x34]]  ;;  %s2283_s8 = sld [smem:[#allocation2 + $0x35]] }
  0x23   :  { %s2523_s9 = sld [smem:[#allocation2 + $0x1]]  ;;  %s2533_s10 = sld [smem:[#allocation2 + $0x2]] }
  0x24   :  { %s2611_s11 = sld [smem:[#allocation2 + $0x4]]  ;;  %s2629_s13 = sld [smem:[#allocation2 + $0x3]] }
  0x25   :  { %v39_v1 = vstv %s1767_s4  ;;  %v251_v4 = vstv %s1776_s5  ;;  %s2636_s14 = sld [smem:[#allocation2 + $0x6]]  ;;  %s2645_s15 = sld [smem:[#allocation2 + $0x7]] }
  0x26   :  { %v2040_v2 = vsub.f32 %v37_v0, %v39_v1  ;;  %v2044_v8 = vsub.f32 %v249_v3, %v251_v4  ;;  %v463_v9 = vstv %s1785_s6  ;;  %s2765_s18 = sld [smem:[#allocation2 + $0x9]]  ;;  %s2778_s19 = sld [smem:[#allocation2 + $0x8]] }
  0x27   :  { %v2046_v11 = vsub.f32 %v461_v5, %v463_v9  ;;  %s2787_s20 = sld [smem:[#allocation2 + $0xa]]  ;;  %s2801_s22 = sld [smem:[#allocation2]] }
  0x28   :  { %v41_v6 = vand.u32 2147483647, %v2040_v2  ;;  %v44_v7 = vand.u32 2139095040, %v2040_v2  ;;  %v253_v13 = vand.u32 2147483647, %v2044_v8  ;;  %v256_v14 = vand.u32 2139095040, %v2044_v8 }
  0x29   :  { %v468_v18 = vand.u32 2139095040, %v2046_v11  ;;  %s1319_s12 = ssub.f32 0.0, %s2533_s10  ;;  %s2803_s23 = sld [smem:[#allocation2 + $0x5]] }
  0x2a   :  { %v45_v10 = vshrl.u32 %v44_v7, 23  ;;  %v48_v12 = vand.u32 8388607, %v41_v6  ;;  %v257_v16 = vshrl.u32 %v256_v14, 23  ;;  %v260_v17 = vand.u32 8388607, %v253_v13 }
  0x2b   :  { %v469_v23 = vshrl.u32 %v468_v18, 23  ;;  %s1323_s16 = ssub.f32 0.0, %s2611_s11  ;;  %s1400_s21 = smul.f32 %s2636_s14, %s2523_s9 }
  0x2c   :  { %v1768_v15 = vadd.s32 4294967169, %v45_v10  ;;  %v49_v20 = vor.u32 8388608, %v48_v12  ;;  %v1777_v21 = vadd.s32 4294967169, %v257_v16  ;;  %v261_v22 = vor.u32 8388608, %v260_v17  ;;  %s1357_s17 = ssub.f32 0.0, %s2645_s15  ;;  %s2814_s25 = sld [smem:[#allocation2 + $0xb]] }
  0x2d   :  { %v2059_v30 = vadd.s32 4294967169, %v469_v23  ;;  %s1361_s24 = ssub.f32 0.0, %s2765_s18  ;;  %s2829_s26 = sld [smem:[#allocation2 + $0xc]] }
  0x2e   :  { %v51_v19 = vadd.s32 1, %v1768_v15  ;;  %v263_v25 = vadd.s32 1, %v1777_v21  ;;  %v2055_v28 = vshll.u32 %v49_v20, 8  ;;  %v2057_v29 = vshll.u32 %v261_v22, 8  ;;  %s1420_s27 = smul.f32 %s2787_s20, %s2523_s9  ;;  %s2869_s3 = sld [smem:[#allocation2 + $0xe]] }
  0x2f   :  { %s1347_s28 = sadd.f32 %s2803_s23, %s2801_s22  ;;  %s2892_s4 = sld [smem:[#allocation2 + $0xd]] }
  0x30   :  { %vm52_vm0 = vcmp.gt.s32.totalorder %v51_v19, 0  ;;  %vm264_vm1 = vcmp.gt.s32.totalorder %v263_v25, 0  ;;  %s2908_s5 = sld [smem:[#allocation2 + $0xf]]  ;;  %s3003_s11 = sld [smem:[#allocation2 + $0x14]] }
  0x31   :  { %v53_v24 = vsel %vm52_vm0, %v51_v19, 0  ;;  %v265_v52 = vsel %vm264_vm1, %v263_v25, 0  ;;  %s3059_s18 = sld [smem:[#allocation2 + $0x20]]  ;;  %s3076_s22 = sld [smem:[#allocation2 + $0x19]] }
  0x32   :  { %v54_v26 = vshrl.u32 %v53_v24, 5  ;;  %v55_v27 = vand.u32 31, %v53_v24  ;;  %v266_v55 = vshrl.u32 %v265_v52, 5  ;;  %v267_v56 = vand.u32 31, %v265_v52  ;;  %s3081_s23 = sld [smem:[#allocation2 + $0x22]] }
  0x33   :  { %s1435_s30 = ssub.f32 0.0, %s2829_s26 }
  0x34   :  { %v56_v31 = vsub.s32 32, %v55_v27  ;;  %v58_v33 = vshll.u32 %v1991_v32, %v55_v27  ;;  %v61_v35 = vshll.u32 %v1992_v34, %v55_v27  ;;  %v64_v37 = vshll.u32 %v1993_v36, %v55_v27  ;;  %s1439_s6 = ssub.f32 0.0, %s2869_s3  ;;  %s3105_s3 = sld [smem:[#allocation2 + $0x2a]] }
  0x35   :  { %v67_v39 = vshll.u32 %v1994_v38, %v55_v27  ;;  %v70_v41 = vshll.u32 %v1995_v40, %v55_v27  ;;  %vm73_vm2 = vcmp.lt.s32.totalorder %v54_v26, 1  ;;  %vm74_vm3 = vcmp.lt.s32.totalorder %v54_v26, 2 }
  0x36   :  { %v57_v42 = vshrl.u32 %v1991_v32, %v56_v31  ;;  %v59_v43 = vshrl.u32 %v1992_v34, %v56_v31  ;;  %v62_v44 = vshrl.u32 %v1993_v36, %v56_v31  ;;  %v65_v45 = vshrl.u32 %v1994_v38, %v56_v31 }
  0x37   :  { %v68_v46 = vshrl.u32 %v1995_v40, %v56_v31  ;;  %v71_v48 = vshrl.u32 %v1996_v47, %v56_v31  ;;  %vm75_vm4 = vcmp.lt.s32.totalorder %v54_v26, 3  ;;  %vm76_vm5 = vcmp.lt.s32.totalorder %v54_v26, 4 }
  0x38   :  { %v60_v49 = vor.u32 %v59_v43, %v58_v33  ;;  %v63_v50 = vor.u32 %v62_v44, %v61_v35  ;;  %v66_v51 = vor.u32 %v65_v45, %v64_v37  ;;  %v268_v0 = vsub.s32 32, %v267_v56 }
  0x39   :  { %v69_v53 = vor.u32 %v68_v46, %v67_v39  ;;  %v72_v54 = vor.u32 %v71_v48, %v70_v41  ;;  %v270_v5 = vshll.u32 %v1991_v32, %v267_v56  ;;  %v273_v19 = vshll.u32 %v1992_v34, %v267_v56 }
  0x3a   :  { %v77_v57 = vsel %vm73_vm2, %v57_v42, %v60_v49  ;;  %v78_v58 = vsel %vm76_vm5, %v66_v51, 2102212464  ;;  %v81_v59 = vsel %vm73_vm2, %v60_v49, %v63_v50  ;;  %v85_v60 = vsel %vm73_vm2, %v63_v50, %v66_v51 }
  0x3b   :  { %v79_v61 = vsel %vm75_vm4, %v63_v50, %v78_v58  ;;  %v82_v62 = vsel %vm76_vm5, %v69_v53, 920167782  ;;  %v86_v63 = vsel %vm76_vm5, %v72_v54, 1326507024  ;;  %v269_v12 = vshrl.u32 %v1991_v32, %v268_v0 }
  0x3c   :  { %v80_v1 = vsel %vm74_vm3, %v77_v57, %v79_v61  ;;  %v83_v3 = vsel %vm75_vm4, %v66_v51, %v82_v62  ;;  %v87_v4 = vsel %vm75_vm4, %v69_v53, %v86_v63  ;;  %v271_v18 = vshrl.u32 %v1992_v34, %v268_v0 }
  0x3d   :  { %v84_v7 = vsel %vm74_vm3, %v81_v59, %v83_v3  ;;  %v88_v9 = vsel %vm74_vm3, %v85_v60, %v87_v4  ;;  %v96_v10 = vmul.u32 %v2055_v28, %v80_v1  ;;  %v274_v20 = vshrl.u32 %v1993_v36, %v268_v0 }
  0x3e   :  { %v2086_v14 = vmul.u32.u64.low %v2055_v28, %v88_v9  ;;  %v2087_v15 = vmul.u32.u64.high %v2055_v28, %v88_v9, %v2086_v14  ;;  %v2090_v16 = vmul.u32.u64.low %v2055_v28, %v84_v7  ;;  %v2091_v17 = vmul.u32.u64.high %v2055_v28, %v84_v7, %v2090_v16 }
  0x3f   :  { %v276_v21 = vshll.u32 %v1993_v36, %v267_v56  ;;  %v277_v22 = vshrl.u32 %v1994_v38, %v268_v0  ;;  %v279_v23 = vshll.u32 %v1994_v38, %v267_v56  ;;  %v280_v24 = vshrl.u32 %v1995_v40, %v268_v0 }
  0x40   :  { %v282_v25 = vshll.u32 %v1995_v40, %v267_v56  ;;  %v272_v26 = vor.u32 %v271_v18, %v270_v5  ;;  %v275_v27 = vor.u32 %v274_v20, %v273_v19  ;;  %v283_v28 = vshrl.u32 %v1996_v47, %v268_v0 }
  0x41   :  { %vm285_vm6 = vcmp.lt.s32.totalorder %v266_v55, 1  ;;  %vm98_vm7 = vc.u32 %v2087_v15, %v2090_v16  ;;  %v99_v31 = vadd.s32 1, %v2091_v17  ;;  %v278_v33 = vor.u32 %v277_v22, %v276_v21  ;;  %v673_v21 = vld [vmem:[#allocation6 + $0x18] sm:$0xff] }
  0x42   :  { %v475_v35 = vadd.s32 1, %v2059_v30  ;;  %v281_v37 = vor.u32 %v280_v24, %v279_v23  ;;  %v284_v39 = vor.u32 %v283_v28, %v282_v25  ;;  %vm286_vm8 = vcmp.lt.s32.totalorder %v266_v55, 2 }
  0x43   :  { %vm287_vm9 = vcmp.lt.s32.totalorder %v266_v55, 3  ;;  %v100_v41 = vsel %vm98_vm7, %v99_v31, %v2091_v17  ;;  %vm288_vm10 = vcmp.lt.s32.totalorder %v266_v55, 4  ;;  %v289_v42 = vsel %vm285_vm6, %v269_v12, %v272_v26 }
  0x44   :  { %v293_v43 = vsel %vm285_vm6, %v272_v26, %v275_v27  ;;  %v101_v44 = vadd.s32 %v100_v41, %v96_v10  ;;  %v290_v45 = vsel %vm288_vm10, %v278_v33, 2102212464  ;;  %v294_v46 = vsel %vm288_vm10, %v281_v37, 920167782 }
  0x45   :  { %v297_v48 = vsel %vm285_vm6, %v275_v27, %v278_v33  ;;  %v291_v49 = vsel %vm287_vm9, %v275_v27, %v290_v45  ;;  %v295_v50 = vsel %vm287_vm9, %v278_v33, %v294_v46  ;;  %v298_v51 = vsel %vm288_vm10, %v284_v39, 1326507024 }
  0x46   :  { %vm476_vm11 = vcmp.gt.s32.totalorder %v475_v35, 0  ;;  %v102_v30 = vadd.s32 536870912, %v101_v44  ;;  %v296_v52 = vsel %vm286_vm8, %v293_v43, %v295_v50  ;;  %v299_v53 = vsel %vm287_vm9, %v281_v37, %v298_v51 }
  0x47   :  { %v292_v54 = vsel %vm286_vm8, %v289_v42, %v291_v49  ;;  %v300_v56 = vsel %vm286_vm8, %v297_v48, %v299_v53  ;;  %v2115_v57 = vmul.u32.u64.low %v2057_v29, %v296_v52  ;;  %v2116_v58 = vmul.u32.u64.high %v2057_v29, %v296_v52, %v2115_v57 }
  0x48   :  { %v2119_v59 = vshrl.u32 %v102_v30, 30  ;;  %v2122_v60 = vmul.u32.u64.low %v2057_v29, %v300_v56  ;;  %v2123_v61 = vmul.u32.u64.high %v2057_v29, %v300_v56, %v2122_v60  ;;  %v477_v62 = vsel %vm476_vm11, %v475_v35, 0 }
  0x49   :  { %v479_v63 = vand.u32 31, %v477_v62  ;;  %v308_v55 = vmul.u32 %v2057_v29, %v292_v54  ;;  %v311_v1 = vadd.s32 1, %v2116_v58  ;;  %v465_v4 = vand.u32 2147483647, %v2046_v11 }
  0x4a   :  { %v104_v0 = vshll.u32 %v2119_v59, 30  ;;  %vm310_vm12 = vc.u32 %v2123_v61, %v2115_v57  ;;  %v675_v17 = vstv %s2125_s1  ;;  %v478_v27 = vshrl.u32 %v477_v62, 5  ;;  %s2931_s1 = sld [smem:[#allocation2 + $0x10]] }
  0x4b   :  { %v312_v5 = vsel %vm310_vm12, %v311_v1, %v2116_v58  ;;  %v480_v7 = vsub.s32 32, %v479_v63  ;;  %v472_v14 = vand.u32 8388607, %v465_v4  ;;  %v482_v29 = vshll.u32 %v1991_v32, %v479_v63 }
  0x4c   :  { %v105_v3 = vsub.s32 %v101_v44, %v104_v0  ;;  %v313_v10 = vadd.s32 %v312_v5, %v308_v55  ;;  %v485_v20 = vshll.u32 %v1992_v34, %v479_v63  ;;  %v488_v24 = vshll.u32 %v1993_v36, %v479_v63 }
  0x4d   :  { %v483_v19 = vshrl.u32 %v1992_v34, %v480_v7  ;;  %v486_v23 = vshrl.u32 %v1993_v36, %v480_v7  ;;  %v489_v25 = vshrl.u32 %v1994_v38, %v480_v7  ;;  %v491_v28 = vshll.u32 %v1994_v38, %v479_v63 }
  0x4e   :  { %v107_v9 = vsub.s32 0, %v105_v3  ;;  %v314_v18 = vadd.s32 536870912, %v313_v10  ;;  %v492_v31 = vshrl.u32 %v1995_v40, %v480_v7  ;;  %v97_v33 = vadd.s32 %v2090_v16, %v2087_v15 }
  0x4f   :  { %v473_v37 = vor.u32 8388608, %v472_v14  ;;  %v2149_v39 = vsub.f32 %v673_v21, %v675_v17  ;;  %v481_v42 = vshrl.u32 %v1991_v32, %v480_v7  ;;  %v494_v43 = vshll.u32 %v1995_v40, %v479_v63 }
  0x50   :  { %v1769_v12 = vmin.u32 %v107_v9, %v105_v3  ;;  %v2143_v26 = vshrl.u32 %v314_v18, 30  ;;  %v495_v44 = vshrl.u32 %v1996_v47, %v480_v7  ;;  %v484_v45 = vor.u32 %v483_v19, %v482_v29 }
  0x51   :  { %v487_v46 = vor.u32 %v486_v23, %v485_v20  ;;  %v490_v48 = vor.u32 %v489_v25, %v488_v24  ;;  %v493_v15 = vor.u32 %v492_v31, %v491_v28  ;;  %vm500_vm14 = vcmp.lt.s32.totalorder %v478_v27, 4 }
  0x52   :  { %v109_v22 = vclz %v1769_v12  ;;  %v316_v41 = vshll.u32 %v2143_v26, 30  ;;  %v496_v54 = vor.u32 %v495_v44, %v494_v43  ;;  %vm497_vm15 = vcmp.lt.s32.totalorder %v478_v27, 1 }
  0x53   :  { %v502_v52 = vsel %vm500_vm14, %v490_v48, 2102212464  ;;  %v513_v56 = vshll.u32 %v473_v37, 8  ;;  %vm499_vm0 = vcmp.lt.s32.totalorder %v478_v27, 3  ;;  %v680_v62 = vand.u32 2139095040, %v2149_v39 }
  0x54   :  { %v1770_v35 = vadd.s32 4294967294, %v109_v22  ;;  %v2155_v50 = vsub.s32 %v313_v10, %v316_v41  ;;  %vm498_vm1 = vcmp.lt.s32.totalorder %v478_v27, 2  ;;  %v501_v0 = vsel %vm497_vm15, %v481_v42, %v484_v45 }
  0x55   :  { %v503_v55 = vsel %vm499_vm0, %v487_v46, %v502_v52  ;;  %v505_v5 = vsel %vm497_vm15, %v484_v45, %v487_v46  ;;  %v506_v7 = vsel %vm500_vm14, %v493_v15, 920167782  ;;  %v509_v12 = vsel %vm497_vm15, %v487_v46, %v490_v48 }
  0x56   :  { %vm1771_vm13 = vcmp.lt.s32.totalorder %v1770_v35, 0  ;;  %v319_v53 = vsub.s32 0, %v2155_v50  ;;  %v507_v10 = vsel %vm499_vm0, %v490_v48, %v506_v7  ;;  %v510_v14 = vsel %vm500_vm14, %v496_v54, 1326507024 }
  0x57   :  { %v112_v49 = vsel %vm1771_vm13, 0, %v1770_v35  ;;  %v127_v29 = vsub.s32 4, %v2119_v59  ;;  %v681_v19 = vshrl.u32 %v680_v62, 23  ;;  %v504_v21 = vsel %vm498_vm1, %v501_v0, %v503_v55  ;;  %v885_v55 = vld [vmem:[#allocation6 + $0x20] sm:$0xff] }
  0x58   :  { %v113_v16 = vsub.s32 32, %v112_v49  ;;  %v114_v51 = vshll.u32 %v105_v3, %v112_v49  ;;  %v117_v30 = vsub.s32 4294967266, %v112_v49  ;;  %v1778_v63 = vmin.u32 %v319_v53, %v2155_v50 }
  0x59   :  { %v508_v22 = vsel %vm498_vm1, %v505_v5, %v507_v10  ;;  %v511_v23 = vsel %vm499_vm0, %v493_v15, %v510_v14  ;;  %v1795_v43 = vadd.s32 4294967169, %v681_v19  ;;  %v520_v27 = vmul.u32 %v513_v56, %v504_v21 }
  0x5a   :  { %v115_v58 = vshrl.u32 %v97_v33, %v113_v16  ;;  %v118_v60 = vadd.s32 127, %v117_v30  ;;  %v321_v9 = vclz %v1778_v63  ;;  %v512_v25 = vsel %vm498_vm1, %v509_v12, %v511_v23 }
  0x5b   :  { %v2175_v28 = vmul.u32.u64.low %v513_v56, %v508_v22  ;;  %v2176_v31 = vmul.u32.u64.high %v513_v56, %v508_v22, %v2175_v28  ;;  %v309_v33 = vadd.s32 %v2115_v57, %v2123_v61  ;;  %vm43_vm3 = vcmp.lt.s32.totalorder %v2040_v2, 0 }
  0x5c   :  { %v116_v1 = vor.u32 %v115_v58, %v114_v51  ;;  %v119_v3 = vshll.u32 %v118_v60, 23  ;;  %v1779_v20 = vadd.s32 4294967294, %v321_v9  ;;  %v687_v49 = vadd.s32 1, %v1795_v43 }
  0x5d   :  { %v2181_v35 = vmul.u32.u64.low %v513_v56, %v512_v25  ;;  %v2182_v37 = vmul.u32.u64.high %v513_v56, %v512_v25, %v2181_v35  ;;  %v523_v48 = vadd.s32 1, %v2176_v31  ;;  %v128_v57 = vsel %vm43_vm3, %v127_v29, %v2119_v59 }
  0x5e   :  { %v120_v17 = vor.u32 4788187, %v119_v3  ;;  %v123_v18 = vcvt.s32.f32 %v116_v1  ;;  %vm1780_vm2 = vcmp.lt.s32.totalorder %v1779_v20, 0  ;;  %vm688_vm5 = vcmp.gt.s32.totalorder %v687_v49, 0 }
  0x5f   :  { %v324_v42 = vsel %vm1780_vm2, 0, %v1779_v20  ;;  %vm522_vm4 = vc.u32 %v2182_v37, %v2175_v28  ;;  %v887_v54 = vstv %s2172_s7  ;;  %vm2197_vm6 = vcmp.le.f32.partialorder %v41_v6, 0.7853982  ;;  %s2939_s7 = sld [smem:[#allocation2 + $0x11]] }
  0x60   :  { %v121_v24 = vand.u32 2147483647, %v120_v17  ;;  %v325_v44 = vsub.s32 32, %v324_v42  ;;  %v326_v45 = vshll.u32 %v2155_v50, %v324_v42  ;;  %v329_v46 = vsub.s32 4294967266, %v324_v42 }
  0x61   :  { %v339_v50 = vsub.s32 4, %v2143_v26  ;;  %v524_v51 = vsel %vm522_vm4, %v523_v48, %v2176_v31  ;;  %vm255_vm7 = vcmp.lt.s32.totalorder %v2044_v8, 0  ;;  %v677_v59 = vand.u32 2147483647, %v2149_v39 }
  0x62   :  { %v124_v41 = vmul.f32 %v123_v18, %v121_v24  ;;  %v327_v61 = vshrl.u32 %v309_v33, %v325_v44  ;;  %v330_v15 = vadd.s32 127, %v329_v46  ;;  %v525_v53 = vadd.s32 %v524_v51, %v520_v27 }
  0x63   :  { %v689_v58 = vsel %vm688_vm5, %v687_v49, 0  ;;  %v130_v60 = vsel %vm2197_vm6, 0, %v128_v57  ;;  %v340_v6 = vsel %vm255_vm7, %v339_v50, %v2143_v26  ;;  %vm2214_vm8 = vcmp.le.f32.partialorder %v253_v13, 0.7853982 }
  0x64   :  { %v125_v16 = vxor.u32 2147483648, %v124_v41  ;;  %v328_v30 = vor.u32 %v327_v61, %v326_v45  ;;  %v331_v52 = vshll.u32 %v330_v15, 23  ;;  %v526_v0 = vadd.s32 536870912, %v525_v53 }
  0x65   :  { %v691_v7 = vand.u32 31, %v689_v58  ;;  %v237_v9 = vadd.s32 3, %v130_v60  ;;  %v684_v12 = vand.u32 8388607, %v677_v59  ;;  %v2220_v14 = vsub.f32 %v885_v55, %v887_v54 }
  0x66   :  { %v332_v62 = vor.u32 4788187, %v331_v52  ;;  %v335_v63 = vcvt.s32.f32 %v328_v30  ;;  %v126_v1 = vsel %vm43_vm3, %v125_v16, %v124_v41  ;;  %v2210_v5 = vshrl.u32 %v526_v0, 30 }
  0x67   :  { %v129_v26 = vsel %vm2197_vm6, %v2040_v2, %v126_v1  ;;  %v342_v18 = vsel %vm2214_vm8, 0, %v340_v6  ;;  %v692_v20 = vsub.s32 32, %v691_v7  ;;  %v2230_v21 = vand.u32 3, %v130_v60 }
  0x68   :  { %v333_v3 = vand.u32 2147483647, %v332_v62  ;;  %v528_v29 = vshll.u32 %v2210_v5, 30  ;;  %1903 = vcosq.f32 %v129_v26  ;;  %v2232_v22 = vand.u32 3, %v237_v9 }
  0x69   :  { %v449_v23 = vadd.s32 3, %v342_v18  ;;  %1905 = vsinq.f32 %v129_v26  ;;  %v685_v25 = vor.u32 8388608, %v684_v12  ;;  %v892_v31 = vand.u32 2139095040, %v2220_v14 }
  0x6a   :  { %v336_v17 = vmul.f32 %v335_v63, %v333_v3  ;;  %v2228_v13 = vsub.s32 %v525_v53, %v528_v29  ;;  %v694_v35 = vshll.u32 %v1991_v32, %v691_v7  ;;  %v697_v41 = vshll.u32 %v1992_v34, %v691_v7 }
  0x6b   :  { %v700_v42 = vshll.u32 %v1993_v36, %v691_v7  ;;  %v695_v44 = vshrl.u32 %v1992_v34, %v692_v20  ;;  %v698_v45 = vshrl.u32 %v1993_v36, %v692_v20  ;;  %v703_v46 = vshll.u32 %v1994_v38, %v691_v7 }
  0x6c   :  { %v337_v19 = vxor.u32 2147483648, %v336_v17  ;;  %v531_v24 = vsub.s32 0, %v2228_v13  ;;  %v701_v27 = vshrl.u32 %v1994_v38, %v692_v20  ;;  %v704_v48 = vshrl.u32 %v1995_v40, %v692_v20 }
  0x6d   :  { %v706_v49 = vshll.u32 %v1995_v40, %v691_v7  ;;  %v707_v57 = vshrl.u32 %v1996_v47, %v692_v20  ;;  %v2252_v15 = vand.u32 3, %v342_v18  ;;  %vm467_vm9 = vcmp.lt.s32.totalorder %v2046_v11, 0 }
  0x6e   :  { %v338_v33 = vsel %vm255_vm7, %v337_v19, %v336_v17  ;;  %v1787_v43 = vmin.u32 %v531_v24, %v2228_v13  ;;  %v2255_v50 = vshrl.u32 %v689_v58, 5  ;;  %vm139_vm10 = vcmp.eq.s32.totalorder %v2230_v21, 2 }
  0x6f   :  { %v341_v61 = vsel %vm2214_vm8, %v2044_v8, %v338_v33  ;;  %v2258_v51 = vand.u32 3, %v449_v23  ;;  %v521_v30 = vadd.s32 %v2175_v28, %v2182_v37  ;;  %v2262_v52 = vshll.u32 %v685_v25, 8 }
  0x70   :  { %v533_v16 = vclz %v1787_v43  ;;  %v893_v53 = vshrl.u32 %v892_v31, 23  ;;  %vm136_vm11 = vcmp.eq.s32.totalorder %v2230_v21, 0  ;;  %v551_v56 = vsub.s32 4, %v2210_v5 }
  0x71   :  { %v696_v60 = vor.u32 %v695_v44, %v694_v35  ;;  %v699_v62 = vor.u32 %v698_v45, %v697_v41  ;;  %1907 = vcosq.f32 %v341_v61  ;;  %vm2268_vm12 = vcmp.le.f32.partialorder %v465_v4, 0.7853982 }
  0x72   :  { %v1788_v54 = vadd.s32 4294967294, %v533_v16  ;;  %v702_v63 = vor.u32 %v701_v27, %v700_v42  ;;  %v705_v0 = vor.u32 %v704_v48, %v703_v46  ;;  %v708_v28 = vor.u32 %v707_v57, %v706_v49  ;;  %v1904_v37 = vpop.eup %1903 }
  0x73   :  { %vm240_vm13 = vcmp.eq.s32.totalorder %v2232_v22, 0  ;;  %vm243_vm14 = vcmp.eq.s32.totalorder %v2232_v22, 2  ;;  %1909 = vsinq.f32 %v341_v61  ;;  %vm709_vm0 = vcmp.lt.s32.totalorder %v2255_v50, 1  ;;  %v1906_v1 = vpop.eup %1905 }
  0x74   :  { %vm1789_vm15 = vcmp.lt.s32.totalorder %v1788_v54, 0  ;;  %vm712_vm1 = vcmp.lt.s32.totalorder %v2255_v50, 4  ;;  %vm135_vm2 = vcmp.lt.s32.totalorder %v2230_v21, 2  ;;  %v693_v55 = vshrl.u32 %v1991_v32, %v692_v20 }
  0x75   :  { %v536_v4 = vsel %vm1789_vm15, 0, %v1788_v54  ;;  %vm710_vm3 = vcmp.lt.s32.totalorder %v2255_v50, 2  ;;  %vm711_vm4 = vcmp.lt.s32.totalorder %v2255_v50, 3  ;;  %v714_v9 = vsel %vm712_vm1, %v702_v63, 2102212464 }
  0x76   :  { %v537_v6 = vsub.s32 32, %v536_v4  ;;  %v538_v3 = vshll.u32 %v2228_v13, %v536_v4  ;;  %v541_v7 = vsub.s32 4294967266, %v536_v4  ;;  %vm239_vm5 = vcmp.lt.s32.totalorder %v2232_v22, 2 }
  0x77   :  { %v717_v10 = vsel %vm709_vm0, %v696_v60, %v699_v62  ;;  %v718_v12 = vsel %vm712_vm1, %v705_v0, 920167782  ;;  %v721_v26 = vsel %vm709_vm0, %v699_v62, %v702_v63  ;;  %v722_v17 = vsel %vm712_vm1, %v708_v28, 1326507024 }
  0x78   :  { %v539_v18 = vshrl.u32 %v521_v30, %v537_v6  ;;  %v542_v29 = vadd.s32 127, %v541_v7  ;;  %v719_v19 = vsel %vm711_vm4, %v702_v63, %v718_v12  ;;  %v723_v13 = vsel %vm711_vm4, %v705_v0, %v722_v17  ;;  %v1097_v6 = vld [vmem:[#allocation6 + $0x28] sm:$0xff] }
  0x79   :  { %v140_v20 = vxor.u32 2147483648, %v1904_v37  ;;  %v552_v23 = vsel %vm467_vm9, %v551_v56, %v2210_v5  ;;  %v713_v24 = vsel %vm709_vm0, %v693_v55, %v696_v60  ;;  %v724_v25 = vsel %vm710_vm3, %v721_v26, %v723_v13 }
  0x7a   :  { %vm133_vm6 = vweird.f32 %v2040_v2  ;;  %vm452_vm7 = vcmp.eq.s32.totalorder %v2258_v51, 0  ;;  %v540_v31 = vor.u32 %v539_v18, %v538_v3  ;;  %v543_v33 = vshll.u32 %v542_v29, 23 }
  0x7b   :  { %v715_v35 = vsel %vm711_vm4, %v699_v62, %v714_v9  ;;  %v720_v41 = vsel %vm710_vm3, %v717_v10, %v719_v19  ;;  %v137_v5 = vxor.u32 2147483648, %v1906_v1  ;;  %v1804_v44 = vadd.s32 4294967169, %v893_v53  ;;  %v2319_v49 = vpop.eup %1907 }
  0x7c   :  { %v2312_v42 = vmul.u32.u64.low %v2262_v52, %v724_v25  ;;  %v2313_v43 = vmul.u32.u64.high %v2262_v52, %v724_v25, %v2312_v42  ;;  %v141_v45 = vsel %vm139_vm10, %v140_v20, %v1906_v1  ;;  %v544_v46 = vor.u32 4788187, %v543_v33 }
  0x7d   :  { %v547_v27 = vcvt.s32.f32 %v540_v31  ;;  %v554_v48 = vsel %vm2268_vm12, 0, %v552_v23  ;;  %v138_v57 = vsel %vm136_vm11, %v1904_v37, %v137_v5  ;;  %v716_v61 = vsel %vm710_vm3, %v713_v24, %v715_v35  ;;  %v2330_v53 = vpop.eup %1909 }
  0x7e   :  { %v2326_v16 = vmul.u32.u64.low %v2262_v52, %v720_v41  ;;  %v2327_v30 = vmul.u32.u64.high %v2262_v52, %v720_v41, %v2326_v16  ;;  %vm455_vm8 = vcmp.eq.s32.totalorder %v2258_v51, 2  ;;  %v545_v54 = vand.u32 2147483647, %v544_v46 }
  0x7f   :  { %v889_v56 = vand.u32 2147483647, %v2220_v14  ;;  %v1099_v60 = vstv %s2283_s8  ;;  %v242_v62 = vsel %vm240_vm13, %v1904_v37, %v137_v5  ;;  %v245_v50 = vsel %vm243_vm14, %v140_v20, %v1906_v1  ;;  %s2971_s8 = sld [smem:[#allocation2 + $0x13]] }
  0x80   :  { %v661_v63 = vadd.s32 3, %v554_v48  ;;  %v899_v0 = vadd.s32 1, %v1804_v44  ;;  %v142_v28 = vsel %vm135_vm2, %v138_v57, %v141_v45  ;;  %v548_v4 = vmul.f32 %v547_v27, %v545_v54 }
  0x81   :  { %v732_v55 = vmul.u32 %v2262_v52, %v716_v61  ;;  %vm734_vm10 = vc.u32 %v2313_v43, %v2326_v16  ;;  %vm348_vm11 = vcmp.eq.s32.totalorder %v2252_v15, 0  ;;  %v349_v3 = vxor.u32 2147483648, %v2330_v53 }
  0x82   :  { %vm351_vm13 = vcmp.eq.s32.totalorder %v2252_v15, 2  ;;  %v352_v37 = vxor.u32 2147483648, %v2319_v49  ;;  %v735_v1 = vadd.s32 1, %v2327_v30  ;;  %vm900_vm14 = vcmp.gt.s32.totalorder %v899_v0, 0 }
  0x83   :  { %v246_v21 = vsel %vm239_vm5, %v242_v62, %v245_v50  ;;  %vm451_vm15 = vcmp.lt.s32.totalorder %v2258_v51, 2  ;;  %v549_v52 = vxor.u32 2147483648, %v548_v4  ;;  %v2354_v7 = vand.u32 8388607, %v889_v56 }
  0x84   :  { %v901_v9 = vsel %vm900_vm14, %v899_v0, 0  ;;  %v2356_v10 = vand.u32 3, %v554_v48  ;;  %v736_v12 = vsel %vm734_vm10, %v735_v1, %v2327_v30  ;;  %v2359_v17 = vsub.f32 %v1097_v6, %v1099_v60 }
  0x85   :  { %v903_v26 = vand.u32 31, %v901_v9  ;;  %v2363_v18 = vsel %vm133_vm6, nan, %v142_v28  ;;  %v550_v22 = vsel %vm467_vm9, %v549_v52, %v548_v4  ;;  %v2367_v29 = vand.u32 3, %v661_v63 }
  0x86   :  { %v737_v19 = vadd.s32 %v736_v12, %v732_v55  ;;  %v2371_v13 = vsel %vm133_vm6, nan, %v246_v21  ;;  %vm345_vm0 = vweird.f32 %v2044_v8  ;;  %vm347_vm1 = vcmp.lt.s32.totalorder %v2252_v15, 2 }
  0x87   :  { %v454_v20 = vsel %vm452_vm7, %v2319_v49, %v349_v3  ;;  %v457_v23 = vsel %vm455_vm8, %v352_v37, %v2330_v53  ;;  %v904_v24 = vsub.s32 32, %v903_v26  ;;  %v553_v25 = vsel %vm2268_vm12, %v2046_v11, %v550_v22 }
  0x88   :  { %vm679_vm9 = vcmp.lt.s32.totalorder %v2149_v39, 0  ;;  %v738_v2 = vadd.s32 536870912, %v737_v19  ;;  %v909_v31 = vshll.u32 %v1992_v34, %v903_v26  ;;  %v915_v33 = vshll.u32 %v1994_v38, %v903_v26 }
  0x89   :  { %v2387_v35 = vshrl.u32 %v901_v9, 5  ;;  %v910_v41 = vshrl.u32 %v1993_v36, %v904_v24  ;;  %v912_v5 = vshll.u32 %v1993_v36, %v903_v26  ;;  %v1104_v42 = vand.u32 2139095040, %v2359_v17 }
  0x8a   :  { %v739_v44 = vshrl.u32 %v738_v2, 30  ;;  %v913_v45 = vshrl.u32 %v1994_v38, %v904_v24  ;;  %v916_v58 = vshrl.u32 %v1995_v40, %v904_v24  ;;  %v918_v46 = vshll.u32 %v1995_v40, %v903_v26 }
  0x8b   :  { %1911 = vcosq.f32 %v553_v25  ;;  %vm2397_vm12 = vcmp.le.f32.partialorder %v677_v59, 0.7853982  ;;  %v906_v48 = vshll.u32 %v1991_v32, %v903_v26  ;;  %v907_v57 = vshrl.u32 %v1992_v34, %v904_v24 }
  0x8c   :  { %v919_v61 = vshrl.u32 %v1996_v47, %v904_v24  ;;  %1913 = vsinq.f32 %v553_v25  ;;  %v740_v30 = vshll.u32 %v739_v44, 30  ;;  %v911_v54 = vor.u32 %v910_v41, %v909_v31 }
  0x8d   :  { %v917_v60 = vor.u32 %v916_v58, %v915_v33  ;;  %v763_v62 = vsub.s32 4, %v739_v44  ;;  %v914_v50 = vor.u32 %v913_v45, %v912_v5  ;;  %vm924_vm2 = vcmp.lt.s32.totalorder %v2387_v35, 4 }
  0x8e   :  { %v920_v63 = vor.u32 %v919_v61, %v918_v46  ;;  %v350_v59 = vsel %vm348_vm11, %v2319_v49, %v349_v3  ;;  %v353_v0 = vsel %vm351_vm13, %v352_v37, %v2330_v53  ;;  %v2411_v28 = vsub.s32 %v737_v19, %v740_v30 }
  0x8f   :  { %vm921_vm3 = vcmp.lt.s32.totalorder %v2387_v35, 1  ;;  %v458_v4 = vsel %vm451_vm15, %v454_v20, %v457_v23  ;;  %v897_v55 = vor.u32 8388608, %v2354_v7  ;;  %v908_v6 = vor.u32 %v907_v57, %v906_v48 }
  0x90   :  { %v1105_v1 = vshrl.u32 %v1104_v42, 23  ;;  %v743_v21 = vsub.s32 0, %v2411_v28  ;;  %v905_v52 = vshrl.u32 %v1991_v32, %v904_v24  ;;  %vm923_vm4 = vcmp.lt.s32.totalorder %v2387_v35, 3 }
  0x91   :  { %v930_v49 = vsel %vm924_vm2, %v917_v60, 920167782  ;;  %v764_v53 = vsel %vm679_vm9, %v763_v62, %v739_v44  ;;  %vm922_vm5 = vcmp.lt.s32.totalorder %v2387_v35, 2  ;;  %v933_v51 = vsel %vm921_vm3, %v911_v54, %v914_v50 }
  0x92   :  { %v934_v3 = vsel %vm924_vm2, %v920_v63, 1326507024  ;;  %v354_v37 = vsel %vm347_vm1, %v350_v59, %v353_v0  ;;  %v2433_v7 = vsel %vm345_vm0, nan, %v458_v4  ;;  %vm563_vm6 = vcmp.eq.s32.totalorder %v2356_v10, 2 }
  0x93   :  { %vm667_vm7 = vcmp.eq.s32.totalorder %v2367_v29, 2  ;;  %v1796_v9 = vmin.u32 %v743_v21, %v2411_v28  ;;  %v926_v12 = vsel %vm924_vm2, %v914_v50, 2102212464  ;;  %vm560_vm8 = vcmp.eq.s32.totalorder %v2356_v10, 0 }
  0x94   :  { %vm664_vm10 = vcmp.eq.s32.totalorder %v2367_v29, 0  ;;  %v929_v15 = vsel %vm921_vm3, %v908_v6, %v911_v54  ;;  %v931_v26 = vsel %vm923_vm4, %v914_v50, %v930_v49  ;;  %v935_v22 = vsel %vm923_vm4, %v917_v60, %v934_v3 }
  0x95   :  { %v937_v19 = vshll.u32 %v897_v55, 8  ;;  %v745_v20 = vclz %v1796_v9  ;;  %v766_v23 = vsel %vm2397_vm12, 0, %v764_v53  ;;  %v936_v24 = vsel %vm922_vm5, %v933_v51, %v935_v22  ;;  %v1912_v2 = vpop.eup %1911 }
  0x96   :  { %v1101_v25 = vand.u32 2147483647, %v2359_v17  ;;  %v2455_v31 = vsel %vm345_vm0, nan, %v354_v37  ;;  %v925_v33 = vsel %vm921_vm3, %v905_v52, %v908_v6  ;;  %v927_v41 = vsel %vm923_vm4, %v911_v54, %v926_v12  ;;  %v1914_v42 = vpop.eup %1913 }
  0x97   :  { %v1813_v5 = vadd.s32 4294967169, %v1105_v1  ;;  %v733_v44 = vadd.s32 %v2326_v16, %v2313_v43  ;;  %v1797_v45 = vadd.s32 4294967294, %v745_v20  ;;  %v932_v58 = vsel %vm922_vm5, %v929_v15, %v931_v26 }
  0x98   :  { %v2466_v46 = vsub.f32 0.0, %v2371_v13  ;;  %v873_v8 = vadd.s32 3, %v766_v23  ;;  %v2468_v48 = vmul.u32.u64.low %v937_v19, %v936_v24  ;;  %v2469_v57 = vmul.u32.u64.high %v937_v19, %v936_v24, %v2468_v48 }
  0x99   :  { %v1315_v61 = vsub.f32 0.0, %v2433_v7  ;;  %vm559_vm11 = vcmp.lt.s32.totalorder %v2356_v10, 2  ;;  %v564_v30 = vxor.u32 2147483648, %v1912_v2  ;;  %vm1798_vm13 = vcmp.lt.s32.totalorder %v1797_v45, 0 }
  0x9a   :  { %v928_v43 = vsel %vm922_vm5, %v925_v33, %v927_v41  ;;  %v2477_v16 = vand.u32 8388607, %v1101_v25  ;;  %v748_v54 = vsel %vm1798_vm13, 0, %v1797_v45  ;;  %v1111_v50 = vadd.s32 1, %v1813_v5 }
  0x9b   :  { %v2479_v60 = vmul.u32.u64.low %v937_v19, %v932_v58  ;;  %v2480_v62 = vmul.u32.u64.high %v937_v19, %v932_v58, %v2479_v60  ;;  %v561_v63 = vxor.u32 2147483648, %v1914_v42  ;;  %v749_v59 = vsub.s32 32, %v748_v54 }
  0x9c   :  { %v750_v0 = vshll.u32 %v2411_v28, %v748_v54  ;;  %v753_v4 = vsub.s32 4294967266, %v748_v54  ;;  %v2484_v55 = vand.u32 3, %v766_v23  ;;  %v2486_v6 = vand.u32 3, %v873_v8 }
  0x9d   :  { %v944_v35 = vmul.u32 %v937_v19, %v928_v43  ;;  %vm1112_vm14 = vcmp.gt.s32.totalorder %v1111_v50, 0  ;;  %v751_v1 = vshrl.u32 %v733_v44, %v749_v59  ;;  %vm946_vm15 = vc.u32 %v2469_v57, %v2479_v60 }
  0x9e   :  { %v754_v21 = vadd.s32 127, %v753_v4  ;;  %v1113_v52 = vsel %vm1112_vm14, %v1111_v50, 0  ;;  %v565_v49 = vsel %vm563_vm6, %v564_v30, %v1914_v42  ;;  %v669_v53 = vsel %vm667_vm7, %v564_v30, %v1914_v42 }
  0x9f   :  { %v947_v28 = vadd.s32 1, %v2480_v62  ;;  %v1115_v51 = vand.u32 31, %v1113_v52  ;;  %v562_v3 = vsel %vm560_vm8, %v1912_v2, %v561_v63  ;;  %v666_v37 = vsel %vm664_vm10, %v1912_v2, %v561_v63 }
  0xa0   :  { %v752_v9 = vor.u32 %v751_v1, %v750_v0  ;;  %v755_v12 = vshll.u32 %v754_v21, 23  ;;  %vm663_vm0 = vcmp.lt.s32.totalorder %v2367_v29, 2  ;;  %vm891_vm1 = vcmp.lt.s32.totalorder %v2220_v14, 0 }
  0xa1   :  { %v948_v15 = vsel %vm946_vm15, %v947_v28, %v2480_v62  ;;  %v1116_v26 = vsub.s32 32, %v1115_v51  ;;  %v1118_v22 = vshll.u32 %v1991_v32, %v1115_v51  ;;  %v1121_v19 = vshll.u32 %v1992_v34, %v1115_v51 }
  0xa2   :  { %v756_v20 = vor.u32 4788187, %v755_v12  ;;  %v759_v23 = vcvt.s32.f32 %v752_v9  ;;  %v949_v24 = vadd.s32 %v948_v15, %v944_v35  ;;  %v2504_v33 = vshrl.u32 %v1113_v52, 5 }
  0xa3   :  { %vm2508_vm2 = vcmp.le.f32.partialorder %v889_v56, 0.7853982  ;;  %v1119_v41 = vshrl.u32 %v1992_v34, %v1116_v26  ;;  %v1122_v5 = vshrl.u32 %v1993_v36, %v1116_v26  ;;  %v1124_v42 = vshll.u32 %v1993_v36, %v1115_v51 }
  0xa4   :  { %v1125_v44 = vshrl.u32 %v1994_v38, %v1116_v26  ;;  %v757_v45 = vand.u32 2147483647, %v756_v20  ;;  %v950_v58 = vadd.s32 536870912, %v949_v24  ;;  %v1127_v8 = vshll.u32 %v1994_v38, %v1115_v51 }
  0xa5   :  { %v1128_v48 = vshrl.u32 %v1995_v40, %v1116_v26  ;;  %vm557_vm3 = vweird.f32 %v2046_v11  ;;  %v566_v56 = vsel %vm559_vm11, %v562_v3, %v565_v49  ;;  %v1120_v30 = vor.u32 %v1119_v41, %v1118_v22 }
  0xa6   :  { %v1123_v43 = vor.u32 %v1122_v5, %v1121_v19  ;;  %v1130_v34 = vshll.u32 %v1995_v40, %v1115_v51  ;;  %v760_v54 = vmul.f32 %v759_v23, %v757_v45  ;;  %v951_v62 = vshrl.u32 %v950_v58, 30 }
  0xa7   :  { %v1129_v36 = vor.u32 %v1128_v48, %v1127_v8  ;;  %v1131_v50 = vshrl.u32 %v1996_v47, %v1116_v26  ;;  %v1109_v38 = vor.u32 8388608, %v2477_v16  ;;  %v1126_v63 = vor.u32 %v1125_v44, %v1124_v42 }
  0xa8   :  { %vm1133_vm4 = vcmp.lt.s32.totalorder %v2504_v33, 1  ;;  %vm1136_vm5 = vcmp.lt.s32.totalorder %v2504_v33, 4  ;;  %v761_v10 = vxor.u32 2147483648, %v760_v54  ;;  %v952_v59 = vshll.u32 %v951_v62, 30 }
  0xa9   :  { %v975_v0 = vsub.s32 4, %v951_v62  ;;  %vm1135_vm6 = vcmp.lt.s32.totalorder %v2504_v33, 3  ;;  %v1117_v40 = vshrl.u32 %v1991_v32, %v1116_v26  ;;  %v1132_v4 = vor.u32 %v1131_v50, %v1130_v34 }
  0xaa   :  { %vm1134_vm7 = vcmp.lt.s32.totalorder %v2504_v33, 2  ;;  %v1142_v47 = vsel %vm1136_vm5, %v1129_v36, 920167782  ;;  %v762_v16 = vsel %vm679_vm9, %v761_v10, %v760_v54  ;;  %v2537_v35 = vsub.s32 %v949_v24, %v952_v59 }
  0xab   :  { %v976_v1 = vsel %vm891_vm1, %v975_v0, %v951_v62  ;;  %v1141_v21 = vsel %vm1133_vm4, %v1120_v30, %v1123_v43  ;;  %v765_v32 = vsel %vm2397_vm12, %v2149_v39, %v762_v16  ;;  %v1138_v52 = vsel %vm1136_vm5, %v1126_v63, 2102212464 }
  0xac   :  { %v1143_v49 = vsel %vm1135_vm6, %v1126_v63, %v1142_v47  ;;  %v2550_v28 = vshll.u32 %v1109_v38, 8  ;;  %v670_v51 = vsel %vm663_vm0, %v666_v37, %v669_v53  ;;  %1915 = vcosq.f32 %v765_v32 }
  0xad   :  { %v955_v3 = vsub.s32 0, %v2537_v35  ;;  %v978_v9 = vsel %vm2508_vm2, 0, %v976_v1  ;;  %1917 = vsinq.f32 %v765_v32  ;;  %v1144_v27 = vsel %vm1134_vm7, %v1141_v21, %v1143_v49 }
  0xae   :  { %v1145_v12 = vsel %vm1133_vm4, %v1123_v43, %v1126_v63  ;;  %v1146_v15 = vsel %vm1136_vm5, %v1132_v4, 1326507024  ;;  %v1137_v29 = vsel %vm1133_vm4, %v1117_v40, %v1120_v30  ;;  %v1139_v53 = vsel %vm1135_vm6, %v1123_v43, %v1138_v52 }
  0xaf   :  { %v1805_v26 = vmin.u32 %v955_v3, %v2537_v35  ;;  %v2569_v37 = vstv %s2523_s9  ;;  %vm775_vm9 = vcmp.eq.s32.totalorder %v2484_v55, 2  ;;  %v1085_v22 = vadd.s32 3, %v978_v9  ;;  %s1510_s9 = ssub.f32 0.0, %s2939_s7 }
  0xb0   :  { %v1147_v19 = vsel %vm1135_vm6, %v1129_v36, %v1146_v15  ;;  %v2575_v20 = vmul.u32.u64.low %v2550_v28, %v1144_v27  ;;  %v2576_v23 = vmul.u32.u64.high %v2550_v28, %v1144_v27, %v2575_v20  ;;  %v2581_v24 = vsel %vm557_vm3, nan, %v566_v56 }
  0xb1   :  { %vm772_vm12 = vcmp.eq.s32.totalorder %v2484_v55, 0  ;;  %vm876_vm8 = vcmp.eq.s32.totalorder %v2486_v6, 0  ;;  %vm879_vm10 = vcmp.eq.s32.totalorder %v2486_v6, 2  ;;  %v957_v41 = vclz %v1805_v26 }
  0xb2   :  { %v1148_v5 = vsel %vm1134_vm7, %v1145_v12, %v1147_v19  ;;  %v2590_v42 = vsel %vm557_vm3, nan, %v670_v51  ;;  %v1140_v44 = vsel %vm1134_vm7, %v1137_v29, %v1139_v53  ;;  %v1317_v45 = vmul.f32 %v2569_v37, %v2433_v7 }
  0xb3   :  { %v1320_v58 = vstv %s2533_s10  ;;  %v1806_v8 = vadd.s32 4294967294, %v957_v41  ;;  %v2598_v48 = vmul.u32.u64.low %v2550_v28, %v1148_v5  ;;  %v2599_v56 = vmul.u32.u64.high %v2550_v28, %v1148_v5, %v2598_v48  ;;  %s3001_s10 = sld [smem:[#allocation2 + $0x12]] }
  0xb4   :  { %v1318_v30 = vmul.f32 %v2569_v37, %v2455_v31  ;;  %vm771_vm11 = vcmp.lt.s32.totalorder %v2484_v55, 2  ;;  %vm875_vm13 = vcmp.lt.s32.totalorder %v2486_v6, 2  ;;  %v945_v11 = vadd.s32 %v2479_v60, %v2469_v57 }
  0xb5   :  { %v2607_v33 = vand.u32 3, %v978_v9  ;;  %v2609_v43 = vand.u32 3, %v1085_v22  ;;  %v1324_v34 = vmul.f32 %v2455_v31, %v2363_v18  ;;  %vm1807_vm14 = vcmp.lt.s32.totalorder %v1806_v8, 0 }
  0xb6   :  { %v1156_v54 = vmul.u32 %v2550_v28, %v1140_v44  ;;  %v1159_v62 = vadd.s32 1, %v2576_v23  ;;  %v2619_v36 = vmul.f32 %v1320_v58, %v2433_v7  ;;  %v960_v50 = vsel %vm1807_vm14, 0, %v1806_v8  ;;  %v1916_v63 = vpop.eup %1915 }
  0xb7   :  { %v2622_v57 = vmul.f32 %v1320_v58, %v2455_v31  ;;  %v1325_v60 = vmul.f32 %v1317_v45, %v2466_v46  ;;  %v1327_v38 = vmul.f32 %v1315_v61, %v2363_v18  ;;  %v961_v10 = vsub.s32 32, %v960_v50  ;;  %v1918_v4 = vpop.eup %1917 }
  0xb8   :  { %v962_v59 = vshll.u32 %v2537_v35, %v960_v50  ;;  %v965_v0 = vsub.s32 4294967266, %v960_v50  ;;  %v1328_v40 = vmul.f32 %v1318_v30, %v2466_v46  ;;  %v776_v47 = vxor.u32 2147483648, %v1916_v63 }
  0xb9   :  { %vm1158_vm15 = vc.u32 %v2599_v56, %v2575_v20  ;;  %v1330_v16 = vstv %s1319_s12  ;;  %v1332_v1 = vmul.f32 %v2455_v31, %v2371_v13  ;;  %v773_v21 = vxor.u32 2147483648, %v1918_v4  ;;  %s1514_s12 = ssub.f32 0.0, %s2971_s8  ;;  %s3145_s8 = sld [smem:[#allocation2 + $0x2c]] }
  0xba   :  { %v963_v32 = vshrl.u32 %v945_v11, %v961_v10  ;;  %v966_v52 = vadd.s32 127, %v965_v0  ;;  %vm1103_vm0 = vcmp.lt.s32.totalorder %v2359_v17, 0  ;;  %v1160_v35 = vsel %vm1158_vm15, %v1159_v62, %v2576_v23 }
  0xbb   :  { %v1161_v49 = vadd.s32 %v1160_v35, %v1156_v54  ;;  %v1333_v28 = vmul.f32 %v1317_v45, %v2363_v18  ;;  %v1335_v51 = vmul.f32 %v1315_v61, %v2371_v13  ;;  %v1336_v3 = vmul.f32 %v1318_v30, %v2363_v18 }
  0xbc   :  { %vm769_vm3 = vweird.f32 %v2149_v39  ;;  %v777_v31 = vsel %vm775_vm9, %v776_v47, %v1918_v4  ;;  %v964_v9 = vor.u32 %v963_v32, %v962_v59  ;;  %v967_v27 = vshll.u32 %v966_v52, 23 }
  0xbd   :  { %vm2652_vm4 = vcmp.le.f32.partialorder %v1101_v25, 0.7853982  ;;  %v2656_v15 = vadd.f32 %v1325_v60, %v1324_v34  ;;  %v774_v7 = vsel %vm772_vm12, %v1916_v63, %v773_v21  ;;  %v878_v61 = vsel %vm876_vm8, %v1916_v63, %v773_v21 }
  0xbe   :  { %v881_v26 = vsel %vm879_vm10, %v776_v47, %v1918_v4  ;;  %v1162_v29 = vadd.s32 536870912, %v1161_v49  ;;  %v968_v53 = vor.u32 4788187, %v967_v27  ;;  %v971_v25 = vcvt.s32.f32 %v964_v9 }
  0xbf   :  { %v2665_v22 = vadd.f32 %v1328_v40, %v1327_v38  ;;  %v2668_v19 = vmul.f32 %v1330_v16, %v2466_v46  ;;  %v2672_v23 = vadd.s32 %v2575_v20, %v2599_v56  ;;  %v2674_v5 = vadd.f32 %v1333_v28, %v1332_v1 }
  0xc0   :  { %v1163_v41 = vshrl.u32 %v1162_v29, 30  ;;  %v2676_v44 = vadd.f32 %v1336_v3, %v1335_v51  ;;  %v778_v45 = vsel %vm771_vm11, %v774_v7, %v777_v31  ;;  %v882_v58 = vsel %vm875_vm13, %v878_v61, %v881_v26 }
  0xc1   :  { %v969_v8 = vand.u32 2147483647, %v968_v53  ;;  %v1339_v48 = vstv %s2629_s13  ;;  %v1341_v34 = vstv %s1323_s16  ;;  %v2684_v54 = vstv %s2636_s14  ;;  %s3029_s13 = sld [smem:[#allocation2 + $0x15]]  ;;  %s3031_s14 = sld [smem:[#allocation2 + $0x1e]] }
  0xc2   :  { %v1164_v30 = vshll.u32 %v1163_v41, 30  ;;  %v1187_v11 = vsub.s32 4, %v1163_v41  ;;  %v2687_v56 = vmul.f32 %v1330_v16, %v2363_v18  ;;  %v2690_v62 = vsub.f32 0.0, %v2590_v42  ;;  %s3047_s16 = sld [smem:[#allocation2 + $0x1f]] }
  0xc3   :  { %v972_v20 = vmul.f32 %v971_v25, %v969_v8  ;;  %v2694_v55 = vmul.f32 %v2684_v54, %v2590_v42  ;;  %v1340_v60 = vmul.f32 %v1339_v48, %v2363_v18  ;;  %v1358_v38 = vstv %s2645_s15  ;;  %s3039_s15 = sld [smem:[#allocation2 + $0x16]] }
  0xc4   :  { %v2696_v6 = vsub.s32 %v1161_v49, %v1164_v30  ;;  %v1188_v50 = vsel %vm1103_vm0, %v1187_v11, %v1163_v41  ;;  %v1342_v10 = vmul.f32 %v1341_v34, %v2466_v46  ;;  %v1344_v59 = vmul.f32 %v1339_v48, %v2371_v13 }
  0xc5   :  { %v973_v63 = vxor.u32 2147483648, %v972_v20  ;;  %v1345_v0 = vmul.f32 %v1341_v34, %v2363_v18  ;;  %v1190_v4 = vsel %vm2652_vm4, 0, %v1188_v50  ;;  %v2710_v47 = vmul.f32 %v2684_v54, %v2581_v24 }
  0xc6   :  { %v1167_v40 = vsub.s32 0, %v2696_v6  ;;  %v1359_v16 = vmul.f32 %v1358_v38, %v2590_v42  ;;  %v2716_v46 = vmul.f32 %v1358_v38, %v2581_v24  ;;  %v1362_v18 = vmul.f32 %v2656_v15, %v2581_v24 }
  0xc7   :  { %v974_v1 = vsel %vm891_vm1, %v973_v63, %v972_v20  ;;  %v1363_v13 = vmul.f32 %v2694_v55, %v2665_v22  ;;  %v2724_v21 = vsel %vm769_vm3, nan, %v778_v45  ;;  %v1367_v52 = vmul.f32 %v2690_v62, %v2656_v15 }
  0xc8   :  { %v977_v42 = vsel %vm2508_vm2, %v2220_v14, %v974_v1  ;;  %v1814_v32 = vmin.u32 %v1167_v40, %v2696_v6  ;;  %v2735_v35 = vsel %vm769_vm3, nan, %v882_v58  ;;  %v2737_v49 = vadd.f32 %v1342_v10, %v1340_v60 }
  0xc9   :  { %1919 = vcosq.f32 %v977_v42  ;;  %v2739_v28 = vadd.f32 %v1345_v0, %v1344_v59  ;;  %v1297_v3 = vadd.s32 3, %v1190_v4  ;;  %v1368_v2 = vmul.f32 %v2710_v47, %v2665_v22 }
  0xca   :  { %1921 = vsinq.f32 %v977_v42  ;;  %v1169_v51 = vclz %v1814_v32  ;;  %vm987_vm1 = vcmp.eq.s32.totalorder %v2607_v33, 2  ;;  %vm1091_vm2 = vcmp.eq.s32.totalorder %v2609_v43, 2 }
  0xcb   :  { %v2745_v31 = vand.u32 3, %v1190_v4  ;;  %v1364_v39 = vmul.f32 %v1359_v16, %v2668_v19  ;;  %v1365_v9 = vadd.f32 %v1363_v13, %v1362_v18  ;;  %v1369_v27 = vmul.f32 %v2716_v46, %v2668_v19 }
  0xcc   :  { %vm984_vm5 = vcmp.eq.s32.totalorder %v2607_v33, 0  ;;  %vm1088_vm6 = vcmp.eq.s32.totalorder %v2609_v43, 0  ;;  %v1815_v7 = vadd.s32 4294967294, %v1169_v51  ;;  %v1370_v61 = vadd.f32 %v1368_v2, %v1367_v52 }
  0xcd   :  { %v1372_v26 = vstv %s1357_s17  ;;  %v1374_v29 = vmul.f32 %v2684_v54, %v2668_v19  ;;  %vm983_vm7 = vcmp.lt.s32.totalorder %v2607_v33, 2  ;;  %v1376_v25 = vmul.f32 %v2674_v5, %v2581_v24  ;;  %s3049_s17 = sld [smem:[#allocation2 + $0x17]] }
  0xce   :  { %v1373_v53 = vmul.f32 %v1372_v26, %v2665_v22  ;;  %v1377_v41 = vmul.f32 %v2694_v55, %v2676_v44  ;;  %v1378_v45 = vmul.f32 %v1359_v16, %v2687_v56  ;;  %vm981_vm9 = vweird.f32 %v2220_v14 }
  0xcf   :  { %vm1087_vm12 = vcmp.lt.s32.totalorder %v2609_v43, 2  ;;  %vm1816_vm8 = vcmp.lt.s32.totalorder %v1815_v7, 0  ;;  %v2763_v58 = vand.u32 3, %v1297_v3  ;;  %v1381_v8 = vmul.f32 %v2690_v62, %v2674_v5 }
  0xd0   :  { %v1382_v48 = vmul.f32 %v2710_v47, %v2676_v44  ;;  %v1172_v30 = vsel %vm1816_vm8, 0, %v1815_v7  ;;  %v2771_v11 = vadd.f32 %v1365_v9, %v1364_v39  ;;  %v2773_v34 = vadd.f32 %v1370_v61, %v1369_v27 }
  0xd1   :  { %v1379_v20 = vadd.f32 %v1377_v41, %v1376_v25  ;;  %v1173_v50 = vsub.s32 32, %v1172_v30  ;;  %v1174_v60 = vshll.u32 %v2696_v6, %v1172_v30  ;;  %v1177_v38 = vsub.s32 4294967266, %v1172_v30 }
  0xd2   :  { %v2776_v63 = vadd.f32 %v1374_v29, %v1373_v53  ;;  %v1383_v59 = vmul.f32 %v2716_v46, %v2687_v56  ;;  %v1384_v0 = vadd.f32 %v1382_v48, %v1381_v8  ;;  %v1389_v40 = vmul.f32 %v2619_v36, %v2581_v24 }
  0xd3   :  { %v2780_v10 = vadd.f32 %v1379_v20, %v1378_v45  ;;  %v1175_v4 = vshrl.u32 %v2672_v23, %v1173_v50  ;;  %v1178_v1 = vadd.s32 127, %v1177_v38  ;;  %v1386_v6 = vmul.f32 %v1372_v26, %v2676_v44  ;;  %v1920_v13 = vpop.eup %1919 }
  0xd4   :  { %v1390_v18 = vmul.f32 %v2694_v55, %v2622_v57  ;;  %v1387_v42 = vmul.f32 %v2684_v54, %v2687_v56  ;;  %v1391_v32 = vmul.f32 %v1359_v16, %v2569_v37  ;;  %v1394_v24 = vmul.f32 %v2690_v62, %v2619_v36  ;;  %v1922_v52 = vpop.eup %1921 }
  0xd5   :  { %v1395_v23 = vmul.f32 %v2710_v47, %v2622_v57  ;;  %v988_v51 = vxor.u32 2147483648, %v1920_v13  ;;  %v1176_v3 = vor.u32 %v1175_v4, %v1174_v60  ;;  %v1179_v2 = vshll.u32 %v1178_v1, 23 }
  0xd6   :  { %v1392_v39 = vadd.f32 %v1390_v18, %v1389_v40  ;;  %v985_v55 = vxor.u32 2147483648, %v1922_v52  ;;  %v2805_v54 = vadd.f32 %v1384_v0, %v1383_v59  ;;  %v1396_v62 = vmul.f32 %v2716_v46, %v2569_v37 }
  0xd7   :  { %v1397_v16 = vadd.f32 %v1395_v23, %v1394_v24  ;;  %v989_v47 = vsel %vm987_vm1, %v988_v51, %v1922_v52  ;;  %v1093_v9 = vsel %vm1091_vm2, %v988_v51, %v1922_v52  ;;  %v1180_v27 = vor.u32 4788187, %v1179_v2 }
  0xd8   :  { %v1183_v7 = vcvt.s32.f32 %v1176_v3  ;;  %v986_v61 = vsel %vm984_vm5, %v1920_v13, %v985_v55  ;;  %v1090_v37 = vsel %vm1088_vm6, %v1920_v13, %v985_v55  ;;  %v2820_v46 = vadd.f32 %v1387_v42, %v1386_v6 }
  0xd9   :  { %v1399_v29 = vmul.f32 %v1372_v26, %v2622_v57  ;;  %v990_v53 = vsel %vm983_vm7, %v986_v61, %v989_v47  ;;  %v1181_v25 = vand.u32 2147483647, %v1180_v27  ;;  %v2825_v41 = vadd.f32 %v1392_v39, %v1391_v32 }
  0xda   :  { %v2827_v45 = vadd.f32 %v1397_v16, %v1396_v62  ;;  %v2833_v8 = vsel %vm981_vm9, nan, %v990_v53  ;;  %v1094_v48 = vsel %vm1087_vm12, %v1090_v37, %v1093_v9  ;;  %v1401_v30 = vstv %s1400_s21  ;;  %s3074_s21 = sld [smem:[#allocation2 + $0x27]] }
  0xdb   :  { %v1403_v26 = vstv %s2778_s19  ;;  %v1184_v33 = vmul.f32 %v1183_v7, %v1181_v25  ;;  %v1405_v50 = vstv %s1361_s24  ;;  %v1407_v60 = vstv %s2787_s20  ;;  %s3065_s19 = sld [smem:[#allocation2 + $0x18]]  ;;  %s3067_s20 = sld [smem:[#allocation2 + $0x21]] }
  0xdc   :  { %v1404_v20 = vmul.f32 %v1403_v26, %v2656_v15  ;;  %v1406_v38 = vmul.f32 %v1405_v50, %v2665_v22  ;;  %v1408_v59 = vmul.f32 %v1407_v60, %v2668_v19  ;;  %v1412_v0 = vmul.f32 %v1403_v26, %v2674_v5  ;;  %s3083_s24 = sld [smem:[#allocation2 + $0x28]] }
  0xdd   :  { %v1413_v43 = vmul.f32 %v1405_v50, %v2676_v44  ;;  %v1185_v40 = vxor.u32 2147483648, %v1184_v33  ;;  %v1414_v4 = vmul.f32 %v1407_v60, %v2687_v56  ;;  %v1418_v1 = vmul.f32 %v1403_v26, %v2619_v36 }
  0xde   :  { %v1419_v15 = vmul.f32 %v1405_v50, %v2622_v57  ;;  %v2851_v6 = vsel %vm981_vm9, nan, %v1094_v48  ;;  %v2855_v22 = vadd.f32 %v1401_v30, %v1399_v29  ;;  %v1409_v19 = vadd.f32 %v1406_v38, %v1404_v20 }
  0xdf   :  { %v1415_v5 = vadd.f32 %v1413_v43, %v1412_v0  ;;  %v1186_v44 = vsel %vm1103_vm0, %v1185_v40, %v1184_v33  ;;  %v1422_v56 = vstv %s1420_s27  ;;  %v2860_v13 = vstv %s2814_s25  ;;  %s3088_s25 = sld [smem:[#allocation2 + $0x1a]]  ;;  %s3094_s27 = sld [smem:[#allocation2 + $0x29]] }
  0xe0   :  { %v1421_v18 = vadd.f32 %v1419_v15, %v1418_v1  ;;  %v1189_v36 = vsel %vm2652_vm4, %v2359_v17, %v1186_v44  ;;  %v1410_v14 = vadd.f32 %v1409_v19, %v1408_v59  ;;  %v1431_v57 = vsub.f32 0.0, %v2735_v35 }
  0xe1   :  { %v1433_v42 = vmul.f32 %v2860_v13, %v2735_v35  ;;  %1923 = vcosq.f32 %v1189_v36  ;;  %v1416_v32 = vadd.f32 %v1415_v5, %v1414_v4  ;;  %v1434_v24 = vmul.f32 %v2860_v13, %v2724_v21 }
  0xe2   :  { %v1436_v23 = vstv %s2829_s26  ;;  %1925 = vsinq.f32 %v1189_v36  ;;  %v1423_v52 = vadd.f32 %v1422_v56, %v1421_v18  ;;  %v1424_v51 = vstv %s1347_s28  ;;  %s3090_s26 = sld [smem:[#allocation2 + $0x23]] }
  0xe3   :  { %v1437_v12 = vmul.f32 %v1436_v23, %v2735_v35  ;;  %vm1199_vm10 = vcmp.eq.s32.totalorder %v2745_v31, 2  ;;  %vm1303_vm11 = vcmp.eq.s32.totalorder %v2763_v58, 2  ;;  %v2878_v3 = vadd.f32 %v1410_v14, %v2737_v49  ;;  %s3096_s28 = sld [smem:[#allocation2 + $0x1b]] }
  0xe4   :  { %v1438_v2 = vmul.f32 %v1436_v23, %v2724_v21  ;;  %v1440_v39 = vmul.f32 %v2771_v11, %v2724_v21  ;;  %v1441_v55 = vmul.f32 %v1433_v42, %v2773_v34  ;;  %vm1196_vm13 = vcmp.eq.s32.totalorder %v2745_v31, 0 }
  0xe5   :  { %vm1300_vm14 = vcmp.eq.s32.totalorder %v2763_v58, 0  ;;  %v1442_v35 = vmul.f32 %v1437_v12, %v2776_v63  ;;  %v1445_v62 = vmul.f32 %v1431_v57, %v2771_v11  ;;  %v1446_v16 = vmul.f32 %v1434_v24, %v2773_v34 }
  0xe6   :  { %v1450_v47 = vstv %s1435_s30  ;;  %v2890_v49 = vadd.f32 %v1416_v32, %v2739_v28  ;;  %v1443_v9 = vadd.f32 %v1441_v55, %v1440_v39  ;;  %v1452_v7 = vmul.f32 %v2860_v13, %v2776_v63  ;;  %s3103_s30 = sld [smem:[#allocation2 + $0x24]] }
  0xe7   :  { %v1451_v27 = vmul.f32 %v1450_v47, %v2773_v34  ;;  %vm1195_vm15 = vcmp.lt.s32.totalorder %v2745_v31, 2  ;;  %vm1299_vm0 = vcmp.lt.s32.totalorder %v2763_v58, 2  ;;  %v2899_v61 = vadd.f32 %v1424_v51, %v1423_v52 }
  0xe8   :  { %v1447_v37 = vmul.f32 %v1438_v2, %v2776_v63  ;;  %v1454_v28 = vmul.f32 %v2780_v10, %v2724_v21  ;;  %v1455_v29 = vmul.f32 %v1433_v42, %v2805_v54  ;;  %v1448_v53 = vadd.f32 %v1446_v16, %v1445_v62 }
  0xe9   :  { %v1456_v25 = vmul.f32 %v1437_v12, %v2820_v46  ;;  %v1459_v48 = vmul.f32 %v1431_v57, %v2780_v10  ;;  %v1460_v30 = vmul.f32 %v1434_v24, %v2805_v54  ;;  %v2910_v26 = vadd.f32 %v1443_v9, %v1442_v35 }
  0xea   :  { %v2912_v33 = vadd.f32 %v1452_v7, %v1451_v27  ;;  %v1457_v20 = vadd.f32 %v1455_v29, %v1454_v28  ;;  %v1461_v50 = vmul.f32 %v1438_v2, %v2820_v46  ;;  %v1464_v38 = vmul.f32 %v1450_v47, %v2805_v54 }
  0xeb   :  { %v1462_v60 = vadd.f32 %v1460_v30, %v1459_v48  ;;  %v1467_v59 = vmul.f32 %v2825_v41, %v2724_v21  ;;  %v1468_v0 = vmul.f32 %v1433_v42, %v2827_v45  ;;  %vm1193_vm3 = vweird.f32 %v2359_v17  ;;  %v1924_v15 = vpop.eup %1923 }
  0xec   :  { %v1465_v43 = vmul.f32 %v2860_v13, %v2820_v46  ;;  %v1469_v40 = vmul.f32 %v1437_v12, %v2855_v22  ;;  %v1472_v4 = vmul.f32 %v1431_v57, %v2825_v41  ;;  %v1473_v1 = vmul.f32 %v1434_v24, %v2827_v45  ;;  %v1926_v18 = vpop.eup %1925 }
  0xed   :  { %v2926_v19 = vadd.f32 %v1448_v53, %v1447_v37  ;;  %v2928_v5 = vadd.f32 %v1457_v20, %v1456_v25  ;;  %v1470_v21 = vadd.f32 %v1468_v0, %v1467_v59  ;;  %v1474_v44 = vmul.f32 %v1438_v2, %v2855_v22 }
  0xee   :  { %v1200_v56 = vxor.u32 2147483648, %v1924_v15  ;;  %v1475_v36 = vadd.f32 %v1473_v1, %v1472_v4  ;;  %v1477_v14 = vmul.f32 %v1450_v47, %v2827_v45  ;;  %v1478_v57 = vmul.f32 %v2860_v13, %v2855_v22 }
  0xef   :  { %v1197_v42 = vxor.u32 2147483648, %v1926_v18  ;;  %v2936_v32 = vadd.f32 %v1462_v60, %v1461_v50  ;;  %v1480_v24 = vstv %s2892_s4  ;;  %v1482_v23 = vstv %s1439_s6  ;;  %s3115_s4 = sld [smem:[#allocation2 + $0x1c]]  ;;  %s3124_s6 = sld [smem:[#allocation2 + $0x2b]] }
  0xf0   :  { %v1201_v52 = vsel %vm1199_vm10, %v1200_v56, %v1926_v18  ;;  %v1305_v51 = vsel %vm1303_vm11, %v1200_v56, %v1926_v18  ;;  %v2945_v12 = vadd.f32 %v1465_v43, %v1464_v38  ;;  %v2947_v2 = vadd.f32 %v1470_v21, %v1469_v40 }
  0xf1   :  { %v1198_v13 = vsel %vm1196_vm13, %v1924_v15, %v1197_v42  ;;  %v1302_v39 = vsel %vm1300_vm14, %v1924_v15, %v1197_v42  ;;  %v1481_v55 = vmul.f32 %v1480_v24, %v2771_v11  ;;  %v1483_v35 = vmul.f32 %v1482_v23, %v2773_v34 }
  0xf2   :  { %v2955_v62 = vadd.f32 %v1475_v36, %v1474_v44  ;;  %v2957_v16 = vadd.f32 %v1478_v57, %v1477_v14  ;;  %v1484_v47 = vstv %s2908_s5  ;;  %v1489_v9 = vmul.f32 %v1480_v24, %v2780_v10  ;;  %s3117_s5 = sld [smem:[#allocation2 + $0x25]] }
  0xf3   :  { %v1202_v27 = vsel %vm1195_vm15, %v1198_v13, %v1201_v52  ;;  %v1306_v7 = vsel %vm1299_vm0, %v1302_v39, %v1305_v51  ;;  %v1485_v37 = vmul.f32 %v1484_v47, %v2776_v63  ;;  %v1486_v11 = vadd.f32 %v1483_v35, %v1481_v55 }
  0xf4   :  { %v1490_v34 = vmul.f32 %v1482_v23, %v2805_v54  ;;  %v1491_v28 = vmul.f32 %v1484_v47, %v2820_v46  ;;  %v1495_v29 = vmul.f32 %v1480_v24, %v2825_v41  ;;  %v1496_v53 = vmul.f32 %v1482_v23, %v2827_v45 }
  0xf5   :  { %v1487_v25 = vadd.f32 %v1486_v11, %v1485_v37  ;;  %v1497_v10 = vmul.f32 %v1484_v47, %v2855_v22  ;;  %v1506_v31 = vsub.f32 0.0, %v2851_v6  ;;  %v2975_v58 = vstv %s2931_s1  ;;  %s3131_s1 = sld [smem:[#allocation2 + $0x1d]] }
  0xf6   :  { %v1492_v63 = vadd.f32 %v1490_v34, %v1489_v9  ;;  %v1498_v48 = vadd.f32 %v1496_v53, %v1495_v29  ;;  %v1508_v54 = vmul.f32 %v2975_v58, %v2851_v6  ;;  %v1509_v46 = vmul.f32 %v2975_v58, %v2833_v8 }
  0xf7   :  { %v2984_v41 = vsel %vm1193_vm3, nan, %v1202_v27  ;;  %v1511_v45 = vstv %s2939_s7  ;;  %v1515_v22 = vmul.f32 %v2910_v26, %v2833_v8  ;;  %v1520_v30 = vmul.f32 %v1506_v31, %v2910_v26  ;;  %s3133_s7 = sld [smem:[#allocation2 + $0x26]] }
  0xf8   :  { %v2992_v20 = vsel %vm1193_vm3, nan, %v1306_v7  ;;  %v1493_v50 = vadd.f32 %v1492_v63, %v1491_v28  ;;  %v1512_v60 = vmul.f32 %v1511_v45, %v2851_v6  ;;  %v1513_v38 = vmul.f32 %v1511_v45, %v2833_v8 }
  0xf9   :  { %v1499_v59 = vadd.f32 %v1498_v48, %v1497_v10  ;;  %v1516_v0 = vmul.f32 %v1508_v54, %v2926_v19  ;;  %v1521_v43 = vmul.f32 %v1509_v46, %v2926_v19  ;;  %v1525_v40 = vstv %s1510_s9  ;;  %s3178_s9 = sld [smem:[#allocation2 + $0x2d]] }
  0xfa   :  { %v2999_v4 = vadd.f32 %v1487_v25, %v2878_v3  ;;  %v1517_v17 = vmul.f32 %v1512_v60, %v2912_v33  ;;  %v1522_v6 = vmul.f32 %v1513_v38, %v2912_v33  ;;  %v1527_v1 = vmul.f32 %v2975_v58, %v2912_v33 }
  0xfb   :  { %v1518_v15 = vadd.f32 %v1516_v0, %v1515_v22  ;;  %v1523_v21 = vadd.f32 %v1521_v43, %v1520_v30  ;;  %v1526_v44 = vmul.f32 %v1525_v40, %v2926_v19  ;;  %v1529_v3 = vmul.f32 %v2928_v5, %v2833_v8 }
  0xfc   :  { %v1530_v18 = vmul.f32 %v1508_v54, %v2936_v32  ;;  %v1531_v56 = vmul.f32 %v1512_v60, %v2945_v12  ;;  %v1534_v36 = vmul.f32 %v1506_v31, %v2928_v5  ;;  %v1535_v14 = vmul.f32 %v1509_v46, %v2936_v32 }
  0xfd   :  { %v3017_v57 = vadd.f32 %v1493_v50, %v2890_v49  ;;  %v3020_v42 = vadd.f32 %v1499_v59, %v2899_v61  ;;  %v3023_v24 = vadd.f32 %v1518_v15, %v1517_v17  ;;  %v1536_v23 = vmul.f32 %v1513_v38, %v2945_v12 }
  0xfe   :  { %v1532_v52 = vadd.f32 %v1530_v18, %v1529_v3  ;;  %v1537_v51 = vadd.f32 %v1535_v14, %v1534_v36  ;;  %v1539_v13 = vmul.f32 %v1525_v40, %v2936_v32  ;;  %v1540_v39 = vmul.f32 %v2975_v58, %v2945_v12 }
  0xff   :  { %v3033_v49 = vadd.f32 %v1523_v21, %v1522_v6  ;;  %v1542_v61 = vmul.f32 %v2947_v2, %v2833_v8  ;;  %v1543_v55 = vmul.f32 %v1508_v54, %v2955_v62  ;;  %v1547_v35 = vmul.f32 %v1506_v31, %v2947_v2 }
 0x100   :  { %v3041_v47 = vadd.f32 %v1527_v1, %v1526_v44  ;;  %v3043_v9 = vadd.f32 %v1532_v52, %v1531_v56  ;;  %v1544_v27 = vmul.f32 %v1512_v60, %v2957_v16  ;;  %v1548_v7 = vmul.f32 %v1509_v46, %v2955_v62 }
 0x101   :  { %v3051_v8 = vadd.f32 %v1537_v51, %v1536_v23  ;;  %v3053_v37 = vadd.f32 %v1540_v39, %v1539_v13  ;;  %v1545_v11 = vadd.f32 %v1543_v55, %v1542_v61  ;;  %v1549_v34 = vmul.f32 %v1513_v38, %v2957_v16 }
 0x102   :  { %v1552_v28 = vmul.f32 %v1525_v40, %v2955_v62  ;;  %v1555_v29 = vstv %s3001_s10  ;;  %v1557_v53 = vstv %s1514_s12  ;;  %v1559_v25 = vstv %s3003_s11  ;;  %s3183_s10 = sld [smem:[#allocation2 + $0x2e]]  ;;  %s3188_s11 = sld [smem:[#allocation2 + $0x2f]] }
 0x103   :  { %v1550_v10 = vadd.f32 %v1548_v7, %v1547_v35  ;;  %v1553_v31 = vmul.f32 %v2975_v58, %v2957_v16  ;;  %v1556_v63 = vmul.f32 %v1555_v29, %v2910_v26  ;;  %v1558_v48 = vmul.f32 %v1557_v53, %v2926_v19  ;;  %s1997_s12 = smov [#allocation7]  }
 0x104   :  { %v3069_v54 = vadd.f32 %v1545_v11, %v1544_v27  ;;  %v1560_v46 = vmul.f32 %v1559_v25, %v2912_v33  ;;  %v1564_v45 = vmul.f32 %v1555_v29, %v2928_v5  ;;  %v1565_v22 = vmul.f32 %v1557_v53, %v2936_v32 }
 0x105   :  { %v1561_v26 = vadd.f32 %v1558_v48, %v1556_v63  ;;  %v1566_v19 = vmul.f32 %v1559_v25, %v2945_v12  ;;  %v1570_v58 = vmul.f32 %v1555_v29, %v2947_v2  ;;  %v1571_v30 = vmul.f32 %v1557_v53, %v2955_v62 }
 0x106   :  { %v1567_v33 = vadd.f32 %v1565_v22, %v1564_v45  ;;  %v1572_v5 = vmul.f32 %v1559_v25, %v2957_v16  ;;  %v1577_v32 = vstv %s3029_s13  ;;  %v1580_v50 = vstv %s3031_s14  ;;  %s1754_s13 = sshll.u32 %s1997_s12, 4  ;;  %s1755_s13 = int_to_ptr.vmem [resolvable:$true] %s1754_s13 }
 0x107   :  { %v1562_v12 = vadd.f32 %v1561_v26, %v1560_v46  ;;  %v1573_v2 = vadd.f32 %v1571_v30, %v1570_v58  ;;  %v1578_v62 = vmul.f32 %v1577_v32, %v2984_v41  ;;  %v1581_v60 = vmul.f32 %v1580_v50, %v2992_v20  ;;  %s1959_s14 = scalar_lea.vmem %s1755_s13, 1536  ;;  %p1964_p12 = scmp.lt.s32.totalorder %s1755_s13, %s1755_s13 }
 0x108   :  { %v3098_v38 = vadd.f32 %v1553_v31, %v1552_v28  ;;  %v1584_v16 = vstv %s3039_s15  ;;  %v1587_v59 = vstv %s3047_s16  ;;  %v1591_v0 = vstv %s3049_s17  ;;  %p1960_p11 = scmp.ne.s32.totalorder %s1755_s13, %s1959_s14  ;;  %p1965_p13 = scmp.lt.s32.totalorder %s1959_s14, %s1959_s14 }
 0x109   :  { %v3107_v43 = vadd.f32 %v1550_v10, %v1549_v34  ;;  %v3110_v40 = vadd.f32 %v1562_v12, %v2999_v4  ;;  %v3112_v17 = vadd.f32 %v1567_v33, %v1566_v19  ;;  %v1585_v6 = vmul.f32 %v1584_v16, %v2984_v41 }
 0x10a   :  { %v3119_v1 = vadd.f32 %v1573_v2, %v1572_v5  ;;  %v1588_v15 = vmul.f32 %v1587_v59, %v2992_v20  ;;  %v1592_v21 = vmul.f32 %v1591_v0, %v2984_v41  ;;  %v1594_v4 = vstv %s3059_s18  ;;  %p1966_p0 = por %p1965_p13, %p1964_p12 }
 0x10b   :  { %v3126_v44 = vadd.f32 %v1581_v60, %v1578_v62  ;;  %v1595_v3 = vmul.f32 %v1594_v4, %v2992_v20  ;;  %v1598_v18 = vstv %s3065_s19  ;;  %v1601_v56 = vstv %s3067_s20 }
 0x10c   :  { %v3135_v36 = vadd.f32 %v1588_v15, %v1585_v6  ;;  %v1599_v14 = vmul.f32 %v1598_v18, %v2984_v41  ;;  %v1602_v23 = vmul.f32 %v1601_v56, %v2992_v20  ;;  %v1605_v52 = vstv %s3074_s21  ;;  %p1967_p1 = pnand %p1966_p0, %p1960_p11 }
 0x10d   :  { %v3140_v51 = vadd.f32 %v1595_v3, %v1592_v21  ;;  %v1608_v13 = vstv %s3076_s22  ;;  %v1611_v39 = vstv %s3081_s23  ;;  %v1615_v61 = vstv %s3083_s24 }
 0x10e   :  { %v1603_v55 = vadd.f32 %v1602_v23, %v1599_v14  ;;  %v1609_v35 = vmul.f32 %v1608_v13, %v2984_v41  ;;  %v1612_v27 = vmul.f32 %v1611_v39, %v2992_v20  ;;  %v1618_v7 = vstv %s3088_s25 }
 0x10f   :  { %v1619_v11 = vmul.f32 %v1618_v7, %v2984_v41  ;;  %v1621_v34 = vstv %s3090_s26  ;;  %v1625_v28 = vstv %s3094_s27  ;;  %v1628_v29 = vstv %s3096_s28 }
 0x110   :  { %v1606_v53 = vadd.f32 %v1605_v52, %v1603_v55  ;;  %v1613_v25 = vadd.f32 %v1612_v27, %v1609_v35  ;;  %v1622_v10 = vmul.f32 %v1621_v34, %v2992_v20  ;;  %v1629_v31 = vmul.f32 %v1628_v29, %v2984_v41 }
 0x111   :  { %v1631_v63 = vstv %s3103_s30  ;;  %v1635_v48 = vstv %s3105_s3  ;;  %v1638_v46 = vstv %s3115_s4  ;;  %v1641_v45 = vstv %s3117_s5 }
 0x112   :  { %v1616_v22 = vadd.f32 %v1615_v61, %v1613_v25  ;;  %v1623_v26 = vadd.f32 %v1622_v10, %v1619_v11  ;;  %v1632_v19 = vmul.f32 %v1631_v63, %v2992_v20  ;;  %v1639_v58 = vmul.f32 %v1638_v46, %v2984_v41 }
 0x113   :  { %v1642_v30 = vmul.f32 %v1641_v45, %v2992_v20  ;;  %v1645_v33 = vstv %s3124_s6  ;;  %v1648_v5 = vstv %s3131_s1  ;;  %v1651_v32 = vstv %s3133_s7 }
 0x114   :  { %v1626_v50 = vadd.f32 %v1625_v28, %v1623_v26  ;;  %v1633_v12 = vadd.f32 %v1632_v19, %v1629_v31  ;;  %v1649_v2 = vmul.f32 %v1648_v5, %v2984_v41  ;;  %v1652_v62 = vmul.f32 %v1651_v32, %v2992_v20 }
 0x115   :  { %v1643_v60 = vadd.f32 %v1642_v30, %v1639_v58  ;;  %v1655_v16 = vstv %s3145_s8  ;;  %v1660_v59 = vmul.f32 %v3126_v44, %v3023_v24  ;;  %v1661_v0 = vmul.f32 %v1606_v53, %v3033_v49 }
 0x116   :  { %v1636_v6 = vadd.f32 %v1635_v48, %v1633_v12  ;;  %v1653_v15 = vadd.f32 %v1652_v62, %v1649_v2  ;;  %v1665_v21 = vmul.f32 %v3135_v36, %v3023_v24  ;;  %v1666_v4 = vmul.f32 %v1616_v22, %v3033_v49 }
 0x117   :  { %v1646_v3 = vadd.f32 %v1645_v33, %v1643_v60  ;;  %v1663_v18 = vadd.f32 %v1661_v0, %v1660_v59  ;;  %v1670_v41 = vmul.f32 %v3140_v51, %v3023_v24  ;;  %v1671_v20 = vmul.f32 %v1626_v50, %v3033_v49 }
 0x118   :  { %v1656_v56 = vadd.f32 %v1655_v16, %v1653_v15  ;;  %v1662_v14 = vmul.f32 %v1636_v6, %v3041_v47  ;;  %v1668_v23 = vadd.f32 %v1666_v4, %v1665_v21  ;;  %v1675_v52 = vmul.f32 %v3126_v44, %v3043_v9 }
 0x119   :  { %v1667_v13 = vmul.f32 %v1646_v3, %v3041_v47  ;;  %v1673_v39 = vadd.f32 %v1671_v20, %v1670_v41  ;;  %v1676_v61 = vmul.f32 %v1606_v53, %v3051_v8  ;;  %v1677_v55 = vmul.f32 %v1636_v6, %v3053_v37 }
 0x11a   :  { %v1664_v35 = vadd.f32 %v1663_v18, %v1662_v14  ;;  %v1672_v27 = vmul.f32 %v1656_v56, %v3041_v47  ;;  %v1680_v7 = vmul.f32 %v3135_v36, %v3043_v9  ;;  %v1681_v11 = vmul.f32 %v1616_v22, %v3051_v8 }
 0x11b   :  { %v1669_v34 = vadd.f32 %v1668_v23, %v1667_v13  ;;  %v1678_v28 = vadd.f32 %v1676_v61, %v1675_v52  ;;  %v1682_v29 = vmul.f32 %v1646_v3, %v3053_v37  ;;  %v1685_v25 = vmul.f32 %v3140_v51, %v3043_v9 }
 0x11c   :  { %v1674_v10 = vadd.f32 %v1673_v39, %v1672_v27  ;;  %v1683_v31 = vadd.f32 %v1681_v11, %v1680_v7  ;;  %v1686_v63 = vmul.f32 %v1626_v50, %v3051_v8  ;;  %v1687_v48 = vmul.f32 %v1656_v56, %v3053_v37  ;;  %1726 = vst [vmem:[#allocation7] sm:$0xff] %v1664_v35 }
 0x11d   :  { %v1679_v46 = vadd.f32 %v1678_v28, %v1677_v55  ;;  %v1690_v45 = vmul.f32 %v3126_v44, %v3069_v54  ;;  %v1691_v26 = vmul.f32 %v1606_v53, %v3107_v43  ;;  %v1692_v19 = vmul.f32 %v1636_v6, %v3098_v38  ;;  %1728 = vst [vmem:[#allocation7 + $0x8] sm:$0xff] %v1669_v34 }
 0x11e   :  { %v1684_v58 = vadd.f32 %v1683_v31, %v1682_v29  ;;  %v1688_v30 = vadd.f32 %v1686_v63, %v1685_v25  ;;  %v1695_v33 = vmul.f32 %v3135_v36, %v3069_v54  ;;  %v1696_v5 = vmul.f32 %v1616_v22, %v3107_v43  ;;  %1730 = vst [vmem:[#allocation7 + $0x10] sm:$0xff] %v1674_v10 }
 0x11f   :  { %v1693_v32 = vadd.f32 %v1691_v26, %v1690_v45  ;;  %v1697_v12 = vmul.f32 %v1646_v3, %v3098_v38  ;;  %v1700_v44 = vmul.f32 %v3140_v51, %v3069_v54  ;;  %v1701_v53 = vmul.f32 %v1626_v50, %v3107_v43  ;;  %1732 = vst [vmem:[#allocation7 + $0x18] sm:$0xff] %v1679_v46 }
 0x120   :  { %v1689_v2 = vadd.f32 %v1688_v30, %v1687_v48  ;;  %v1698_v62 = vadd.f32 %v1696_v5, %v1695_v33  ;;  %v1702_v60 = vmul.f32 %v1656_v56, %v3098_v38  ;;  %v1705_v16 = vstv %s3178_s9  ;;  %1734 = vst [vmem:[#allocation7 + $0x20] sm:$0xff] %v1684_v58 }
 0x121   :  { %v1694_v36 = vadd.f32 %v1693_v32, %v1692_v19  ;;  %v1703_v59 = vadd.f32 %v1701_v53, %v1700_v44  ;;  %v1706_v22 = vmul.f32 %v1705_v16, %v3023_v24  ;;  %v1707_v0 = vstv %s3183_s10 }
 0x122   :  { %v1699_v6 = vadd.f32 %v1698_v62, %v1697_v12  ;;  %v1708_v15 = vmul.f32 %v1707_v0, %v3033_v49  ;;  %v1709_v21 = vstv %s3188_s11  ;;  %v1714_v51 = vmul.f32 %v1705_v16, %v3043_v9  ;;  %1736 = vst [vmem:[#allocation7 + $0x28] sm:$0xff] %v1689_v2 }
 0x123   :  { %v1704_v50 = vadd.f32 %v1703_v59, %v1702_v60  ;;  %v1710_v4 = vmul.f32 %v1709_v21, %v3041_v47  ;;  %v1715_v3 = vmul.f32 %v1707_v0, %v3051_v8  ;;  %v1716_v18 = vmul.f32 %v1709_v21, %v3053_v37  ;;  %1738 = vst [vmem:[#allocation7 + $0x30] sm:$0xff] %v1694_v36 }
 0x124   :  { %v1711_v41 = vadd.f32 %v1708_v15, %v1706_v22  ;;  %v1720_v20 = vmul.f32 %v1705_v16, %v3069_v54  ;;  %v1721_v24 = vmul.f32 %v1707_v0, %v3107_v43  ;;  %v1722_v56 = vmul.f32 %v1709_v21, %v3098_v38  ;;  %1740 = vst [vmem:[#allocation7 + $0x38] sm:$0xff] %v1699_v6 }
 0x125   :  { %v1569_v49 = vadd.f32 %v3112_v17, %v3017_v57  ;;  %v1717_v9 = vadd.f32 %v1715_v3, %v1714_v51  ;;  %1742 = vst [vmem:[#allocation7 + $0x40] sm:$0xff] %v1704_v50  ;;  %v1575_v47 = vadd.f32 %v3119_v1, %v3020_v42 }
 0x126   :  { %v1712_v8 = vadd.f32 %v1711_v41, %v1710_v4  ;;  %v1723_v14 = vadd.f32 %v1721_v24, %v1720_v20 }
 0x127   :  { %v1718_v37 = vadd.f32 %v1717_v9, %v1716_v18 }
 0x128   :  { %v1713_v54 = vadd.f32 %v1712_v8, %v3110_v40  ;;  %v1724_v23 = vadd.f32 %v1723_v14, %v1722_v56 }
 0x129   :  { %v1719_v43 = vadd.f32 %v1718_v37, %v1569_v49 }
 0x12a   :  { %v1725_v52 = vadd.f32 %v1724_v23, %v1575_v47  ;;  %1744 = vst [vmem:[#allocation7 + $0x48] sm:$0xff] %v1713_v54 }
 0x12b   :  { %1746 = vst [vmem:[#allocation7 + $0x50] sm:$0xff] %v1719_v43 }
 0x12c   :  { %1748 = vst [vmem:[#allocation7 + $0x58] sm:$0xff] %v1725_v52 }
 0x12d   :  { %1970 = shalt.err (!%p1967_p1)
}
 0x12e   :  { %s1971_s17 = scalar_lea.hbm %s3245_s2, 1536 }
 0x12f   :  { %p1972_p2 = scmp.ne.s32.totalorder %s3245_s2, %s1971_s17  ;;  %p1975_p3 = scmp.lt.u32.totalorder %s1971_s17, %s3245_s2 }
 0x131   :  { %p1977_p4 = pnand %p1975_p3, %p1972_p2 }
 0x133   :  { %1980 = shalt.err (!%p1977_p4)
}
 0x134   :  { %1760 = dma.vmem_to_hbm [thread:$0]  %s1755_s13, 1536, %s3245_s2, [#allocation4], %s1989_s0, %s1989_s0, %s1990_s29  }
 0x135   :  { %1985 = dma.done.wait [#allocation4], 1536  }
 0x136   :  { %1986 = vsyncadd [#allocation4], 4294965760 }
 0x137   :  { %1764 = vsyncpa [#allocation3], 1 }
 0x138   :  { %1765 = vsyncpa [#allocation4], 1 }
 0x139   :  { %1766 = vsyncpa [#allocation5], 1 }

</bundles_post_ra>
